<compile_context>
chip_gen: v6e
topology: v6e:2x2x1
jax: 0.10.0
libtpu: 0.0.40
codegen_flags: <defaults>
</compile_context>

<pallas_src>
import functools
import math

import jax
import jax.numpy as jnp
from jax.experimental import pallas as pl
from jax.experimental.pallas import tpu as pltpu


# ----------------------------------------------------------------------------
# In-kernel helpers
# ----------------------------------------------------------------------------
def _layernorm(y, g, b, eps=1e-5):
    mu = jnp.mean(y, axis=-1, keepdims=True)
    var = jnp.mean(jnp.square(y - mu), axis=-1, keepdims=True)
    return (y - mu) * jax.lax.rsqrt(var + eps) * g + b


def _mm(a_f32, w_bf16):
    # a @ W with weights pre-transposed to (K, N); bf16 MXU inputs, f32 accum.
    return jnp.dot(a_f32.astype(jnp.bfloat16), w_bf16,
                   preferred_element_type=jnp.float32)


# ----------------------------------------------------------------------------
# Fused encoder stack kernel: grid axis = layer, weights streamed per step.
# ----------------------------------------------------------------------------
def encoder_stack_kernel(x_ref, seg_ref,
                         in_w, in_b, out_w, out_b, ln1_g, ln1_b,
                         ff1_w, ff1_b, ff2_w, ff2_b, ln2_g, ln2_b,
                         lnf_g, lnf_b,
                         o_ref, h_ref, *, n_batch):
    l = pl.program_id(0)

    @pl.when(l == 0)
    def _():
        h_ref[...] = x_ref[...]

    x = h_ref[...]                                   # (M, E) f32, rows = (b, s)
    M, E = x.shape
    B = n_batch
    S = M // B

    # ---- fused QKV projection (attention scale pre-folded into Wq / bq) ----
    qkv = _mm(x, in_w[...]) + in_b[...]              # (M, 3E) f32
    q, k, v = qkv[:, :E], qkv[:, E:2 * E], qkv[:, 2 * E:]

    # ---- multi-head attention over the batch axis (batch_first=False quirk)
    # Token block j of every attention group is the sublane-aligned row block
    # [j*S, (j+1)*S).  One full-width matmul against the block-diagonal
    # segment-sum matrix yields per-head scores already replicated across
    # each head's dh lanes -> everything else is full-width VPU work.
    prods = []
    for i in range(B):                               # static, tiny (B = 2)
        qi = q[i * S:(i + 1) * S, :]
        for j in range(B):
            prods.append(qi * k[j * S:(j + 1) * S, :])
    scores = jnp.dot(jnp.concatenate(prods, axis=0), seg_ref[...],
                     preferred_element_type=jnp.float32)     # (B*B*S, E)

    outs = []
    for i in range(B):
        s_i = [scores[(i * B + j) * S:(i * B + j + 1) * S, :] for j in range(B)]
        m = s_i[0]
        for j in range(1, B):
            m = jnp.maximum(m, s_i[j])
        e_i = [jnp.exp(s - m) for s in s_i]
        den = e_i[0]
        num = e_i[0] * v[0:S, :]
        for j in range(1, B):
            den = den + e_i[j]
            num = num + e_i[j] * v[j * S:(j + 1) * S, :]
        outs.append(num / den)                       # exact f32 divide
    attn = jnp.concatenate(outs, axis=0)             # (M, E)

    # ---- out-proj + residual + LN1, FFN(relu) + residual + LN2 -------------
    y = _layernorm(x + _mm(attn, out_w[...]) + out_b[...],
                   ln1_g[...], ln1_b[...])
    h1 = jnp.maximum(_mm(y, ff1_w[...]) + ff1_b[...], 0.0)
    out = _layernorm(y + _mm(h1, ff2_w[...]) + ff2_b[...],
                     ln2_g[...], ln2_b[...])
    h_ref[...] = out                                 # carry to next layer step

    # ---- final LayerNorm fused into the last layer step (runs once) --------
    @pl.when(l == pl.num_programs(0) - 1)
    def _():
        o_ref[...] = _layernorm(out, lnf_g[...], lnf_b[...])


def encoder_stack(x2, seg, p, n_batch):
    """Run all encoder layers + ln_f in a single pallas_call."""
    M, E = x2.shape
    n_layer = p["in_w"].shape[0]

    def resident(shape):
        n = len(shape)
        return pl.BlockSpec(shape, lambda l, n=n: (0,) * n)

    def per_layer(arr):
        shape = arr.shape
        return pl.BlockSpec((None,) + shape[1:],
                            lambda l, r=len(shape) - 1: (l,) + (0,) * r)

    layer_args = [p["in_w"], p["in_b"], p["out_w"], p["out_b"],
                  p["ln1_g"], p["ln1_b"], p["ff1_w"], p["ff1_b"],
                  p["ff2_w"], p["ff2_b"], p["ln2_g"], p["ln2_b"]]

    kernel = functools.partial(encoder_stack_kernel, n_batch=n_batch)
    return pl.pallas_call(
        kernel,
        out_shape=jax.ShapeDtypeStruct((M, E), jnp.float32),
        grid=(n_layer,),
        in_specs=[resident((M, E)), resident((E, E))]
                 + [per_layer(a) for a in layer_args]
                 + [resident((1, E)), resident((1, E))],
        out_specs=resident((M, E)),
        scratch_shapes=[pltpu.VMEM((M, E), jnp.float32)],
        compiler_params=pltpu.CompilerParams(
            dimension_semantics=("arbitrary",),
            vmem_limit_bytes=32 * 1024 * 1024),
    )(x2, seg, *layer_args, p["lnf_g"], p["lnf_b"])


# ----------------------------------------------------------------------------
# Vocab head: pure lane-dense GEMM (ln_f already applied in the stack kernel)
# ----------------------------------------------------------------------------
def head_kernel(x_ref, w_ref, o_ref):
    o_ref[...] = jnp.dot(x_ref[...].astype(jnp.bfloat16), w_ref[...],
                         preferred_element_type=jnp.float32)


def vocab_head(x2, w):
    M, E = x2.shape
    V = w.shape[1]
    tn = 256 if V % 256 == 0 else V        # lane-dense vocab tiles
    return pl.pallas_call(
        head_kernel,
        out_shape=jax.ShapeDtypeStruct((M, V), jnp.float32),
        grid=(V // tn,),
        in_specs=[pl.BlockSpec((M, E), lambda j: (0, 0)),
                  pl.BlockSpec((E, tn), lambda j: (0, j))],
        out_specs=pl.BlockSpec((M, tn), lambda j: (0, j)),
        compiler_params=pltpu.CompilerParams(
            dimension_semantics=("parallel",),
            vmem_limit_bytes=32 * 1024 * 1024),
    )(x2, w)


# ----------------------------------------------------------------------------
# Model glue (plain JAX: embedding gather, reshapes, final logits slice)
# ----------------------------------------------------------------------------
def drc_forward(params, input_ids, max_length, n_head):
    B, S = input_ids.shape
    E = params["tok_emb"].shape[1]
    V = params["head_w"].shape[1]
    dh = E // n_head

    # TODO(synk): embedding gather stays in XLA (no clean Pallas gather here).
    tok = jnp.take(params["tok_emb"], input_ids, axis=0)            # (B, S, E)
    pos = params["pos_emb"][:S][None, :, :]                         # (1, S, E)
    x2 = (tok + pos).reshape(B * S, E)                              # rows=(b,s)

    # Block-diagonal per-head segment-sum matrix (constant, built once).
    lane = jnp.arange(E)
    seg = (lane[:, None] // dh == lane[None, :] // dh).astype(jnp.float32)

    h = encoder_stack(x2, seg, params, n_batch=B)                   # (B*S, E)
    logits = vocab_head(h, params["head_w"]).reshape(B, S, V)       # (B, S, V)
    # Slice to max_length AFTER the head: keeps the head GEMM 8-row aligned.
    return logits[:, :min(max_length, S), :]


# ----------------------------------------------------------------------------
# Deterministic parameters: stacked per-layer weights, pre-transposed (K, N),
# bf16 matmul weights, attention scale folded into Q.
# ----------------------------------------------------------------------------
def init_params(key, vocab_size, n_positions, n_embd, n_layer, n_head, d_ff):
    E, L = n_embd, n_layer
    scale = 1.0 / math.sqrt(E // n_head)

    def nrm(k, shape, s=0.02):
        return s * jax.random.normal(k, shape, dtype=jnp.float32)

    k = jax.random.split(key, 7)
    in_w = nrm(k[3], (L, E, 3 * E))
    in_w = in_w.at[:, :, :E].multiply(scale)         # fold 1/sqrt(dh) into Wq
    in_b = jnp.zeros((L, 1, 3 * E), jnp.float32)     # zero bias -> fold no-op

    return {
        "tok_emb": nrm(k[0], (vocab_size, E)),
        "pos_emb": nrm(k[1], (n_positions, E)),
        "head_w": nrm(k[2], (E, vocab_size)).astype(jnp.bfloat16),  # (K, N)
        "lnf_g": jnp.ones((1, E), jnp.float32),
        "lnf_b": jnp.zeros((1, E), jnp.float32),
        "in_w": in_w.astype(jnp.bfloat16),            # (L, E, 3E)
        "in_b": in_b,
        "out_w": nrm(k[4], (L, E, E)).astype(jnp.bfloat16),
        "out_b": jnp.zeros((L, 1, E), jnp.float32),
        "ln1_g": jnp.ones((L, 1, E), jnp.float32),
        "ln1_b": jnp.zeros((L, 1, E), jnp.float32),
        "ff1_w": nrm(k[5], (L, E, d_ff)).astype(jnp.bfloat16),
        "ff1_b": jnp.zeros((L, 1, d_ff), jnp.float32),
        "ff2_w": nrm(k[6], (L, d_ff, E)).astype(jnp.bfloat16),
        "ff2_b": jnp.zeros((L, 1, E), jnp.float32),
        "ln2_g": jnp.ones((L, 1, E), jnp.float32),
        "ln2_b": jnp.zeros((L, 1, E), jnp.float32),
    }


# ----------------------------------------------------------------------------
# Main
# ----------------------------------------------------------------------------
if __name__ == "__main__":
    # small-but-consistent hyperparameters (module defaults scaled down)
    vocab_size = 512
    n_positions = 64
    n_embd = 128
    n_layer = 2
    n_head = 4
    d_ff = 2048        # nn.TransformerEncoderLayer default dim_feedforward
    batch, seq = 2, 8
    max_length = 6

    key = jax.random.PRNGKey(0)
    pkey, ikey = jax.random.split(key)
    params = init_params(pkey, vocab_size, n_positions, n_embd, n_layer,
                         n_head, d_ff)
    input_ids = jax.random.randint(ikey, (batch, seq), 0, vocab_size,
                                   dtype=jnp.int32)

    fwd = jax.jit(drc_forward, static_argnames=("max_length", "n_head"))
    logits = jax.block_until_ready(fwd(params, input_ids, max_length, n_head))

    assert logits.shape == (batch, min(max_length, seq), vocab_size), logits.shape
    assert logits.dtype == jnp.float32
    assert bool(jnp.all(jnp.isfinite(logits)))
    print("KERNEL_OK")
</pallas_src>

<mosaic_0001>
module attributes {stable_mosaic.version = 11 : i64} {
  func.func @head_kernel(%arg0: i32, %arg1: memref<16x128xf32, #tpu.memory_space<vmem>>, %arg2: memref<128x256xbf16, #tpu.memory_space<vmem>>, %arg3: memref<16x256xf32, #tpu.memory_space<vmem>>) attributes {dimension_semantics = [#tpu.dimension_semantics<parallel>], iteration_bounds = array<i64: 2>, scalar_prefetch = 0 : i64, scratch_operands = 0 : i64, tpu.core_type = #tpu.core_type<tc>, window_params = [{pipeline_mode = #tpu.pipeline_mode<synchronous>, transform_indices = @transform_0, window_bounds = array<i64: 16, 128>}, {transform_indices = @transform_1, window_bounds = array<i64: 128, 256>}, {transform_indices = @transform_2, window_bounds = array<i64: 16, 256>}]} {
    %c0 = arith.constant 0 : index
    %c0_0 = arith.constant 0 : index
    %0 = vector.load %arg1[%c0, %c0_0] : memref<16x128xf32, #tpu.memory_space<vmem>>, vector<16x128xf32>
    %1 = arith.truncf %0 : vector<16x128xf32> to vector<16x128xbf16>
    %c0_1 = arith.constant 0 : index
    %c0_2 = arith.constant 0 : index
    %2 = vector.load %arg2[%c0_1, %c0_2] : memref<128x256xbf16, #tpu.memory_space<vmem>>, vector<128x256xbf16>
    %cst = arith.constant dense<0.000000e+00> : vector<16x256xf32>
    %3 = tpu.matmul %1, %2, %cst {dimension_numbers = #tpu.dot_dimension_numbers<[1], [0], [0], [1], [0, 0, 1, 1], [], []>} : vector<16x128xbf16>, vector<128x256xbf16>, vector<16x256xf32> -> vector<16x256xf32>
    %c0_3 = arith.constant 0 : index
    %c0_4 = arith.constant 0 : index
    %4 = vector.load %arg3[%c0_3, %c0_4] : memref<16x256xf32, #tpu.memory_space<vmem>>, vector<16x256xf32>
    tpu.vector_store %arg3[%c0_3, %c0_4], %3 {strides = array<i32>} : memref<16x256xf32, #tpu.memory_space<vmem>>, vector<16x256xf32>,
    return
  }
  func.func @transform_0(%arg0: i32) -> (i32, i32) {
    %c0_i32 = arith.constant 0 : i32
    %c0_i32_0 = arith.constant 0 : i32
    %c0_i32_1 = arith.constant 0 : i32
    return %c0_i32, %c0_i32_0 : i32, i32
  }
  func.func @transform_1(%arg0: i32) -> (i32, i32) {
    %c0_i32 = arith.constant 0 : i32
    %c0_i32_0 = arith.constant 0 : i32
    return %c0_i32, %arg0 : i32, i32
  }
  func.func @transform_2(%arg0: i32) -> (i32, i32) {
    %c0_i32 = arith.constant 0 : i32
    %c0_i32_0 = arith.constant 0 : i32
    return %c0_i32, %arg0 : i32, i32
  }
}

module attributes {stable_mosaic.version = 11 : i64} {
  func.func @encoder_stack_kernel(%arg0: i32, %arg1: memref<16x128xf32, #tpu.memory_space<vmem>>, %arg2: memref<128x128xf32, #tpu.memory_space<vmem>>, %arg3: memref<1x128x384xbf16, #tpu.memory_space<vmem>>, %arg4: memref<1x1x384xf32, #tpu.memory_space<vmem>>, %arg5: memref<1x128x128xbf16, #tpu.memory_space<vmem>>, %arg6: memref<1x1x128xf32, #tpu.memory_space<vmem>>, %arg7: memref<1x1x128xf32, #tpu.memory_space<vmem>>, %arg8: memref<1x1x128xf32, #tpu.memory_space<vmem>>, %arg9: memref<1x128x2048xbf16, #tpu.memory_space<vmem>>, %arg10: memref<1x1x2048xf32, #tpu.memory_space<vmem>>, %arg11: memref<1x2048x128xbf16, #tpu.memory_space<vmem>>, %arg12: memref<1x1x128xf32, #tpu.memory_space<vmem>>, %arg13: memref<1x1x128xf32, #tpu.memory_space<vmem>>, %arg14: memref<1x1x128xf32, #tpu.memory_space<vmem>>, %arg15: memref<1x128xf32, #tpu.memory_space<vmem>>, %arg16: memref<1x128xf32, #tpu.memory_space<vmem>>, %arg17: memref<16x128xf32, #tpu.memory_space<vmem>>, %arg18: memref<16x128xf32, #tpu.memory_space<vmem>>) attributes {dimension_semantics = [#tpu.dimension_semantics<arbitrary>], iteration_bounds = array<i64: 2>, scalar_prefetch = 0 : i64, scratch_operands = 1 : i64, tpu.core_type = #tpu.core_type<tc>, window_params = [{pipeline_mode = #tpu.pipeline_mode<synchronous>, transform_indices = @transform_0, window_bounds = array<i64: 16, 128>}, {pipeline_mode = #tpu.pipeline_mode<synchronous>, transform_indices = @transform_1, window_bounds = array<i64: 128, 128>}, {transform_indices = @transform_2, window_bounds = array<i64: 1, 128, 384>}, {transform_indices = @transform_3, window_bounds = array<i64: 1, 1, 384>}, {transform_indices = @transform_4, window_bounds = array<i64: 1, 128, 128>}, {transform_indices = @transform_5, window_bounds = array<i64: 1, 1, 128>}, {transform_indices = @transform_6, window_bounds = array<i64: 1, 1, 128>}, {transform_indices = @transform_7, window_bounds = array<i64: 1, 1, 128>}, {transform_indices = @transform_8, window_bounds = array<i64: 1, 128, 2048>}, {transform_indices = @transform_9, window_bounds = array<i64: 1, 1, 2048>}, {transform_indices = @transform_10, window_bounds = array<i64: 1, 2048, 128>}, {transform_indices = @transform_11, window_bounds = array<i64: 1, 1, 128>}, {transform_indices = @transform_12, window_bounds = array<i64: 1, 1, 128>}, {transform_indices = @transform_13, window_bounds = array<i64: 1, 1, 128>}, {pipeline_mode = #tpu.pipeline_mode<synchronous>, transform_indices = @transform_14, window_bounds = array<i64: 1, 128>}, {pipeline_mode = #tpu.pipeline_mode<synchronous>, transform_indices = @transform_15, window_bounds = array<i64: 1, 128>}, {pipeline_mode = #tpu.pipeline_mode<synchronous>, transform_indices = @transform_16, window_bounds = array<i64: 16, 128>}]} {
    %c0_i32 = arith.constant 0 : i32
    %0 = arith.cmpi eq, %arg0, %c0_i32 : i32
    %1 = arith.extui %0 : i1 to i32
    %c0_i32_0 = arith.constant 0 : i32
    %2 = arith.cmpi ne, %1, %c0_i32_0 : i32
    scf.if %2 {
      %c0_58 = arith.constant 0 : index
      %c0_59 = arith.constant 0 : index
      %141 = vector.load %arg1[%c0_58, %c0_59] : memref<16x128xf32, #tpu.memory_space<vmem>>, vector<16x128xf32>
      %c0_60 = arith.constant 0 : index
      %c0_61 = arith.constant 0 : index
      %142 = vector.load %arg18[%c0_60, %c0_61] : memref<16x128xf32, #tpu.memory_space<vmem>>, vector<16x128xf32>
      tpu.vector_store %arg18[%c0_60, %c0_61], %141 {strides = array<i32>} : memref<16x128xf32, #tpu.memory_space<vmem>>, vector<16x128xf32>,
    } else {
    }
    %c0 = arith.constant 0 : index
    %c0_1 = arith.constant 0 : index
    %3 = vector.load %arg18[%c0, %c0_1] : memref<16x128xf32, #tpu.memory_space<vmem>>, vector<16x128xf32>
    %c0_2 = arith.constant 0 : index
    %c0_3 = arith.constant 0 : index
    %c0_4 = arith.constant 0 : index
    %4 = vector.load %arg3[%c0_2, %c0_3, %c0_4] : memref<1x128x384xbf16, #tpu.memory_space<vmem>>, vector<1x128x384xbf16>
    %5 = vector.shape_cast %4 : vector<1x128x384xbf16> to vector<128x384xbf16>
    %6 = arith.truncf %3 : vector<16x128xf32> to vector<16x128xbf16>
    %cst = arith.constant dense<0.000000e+00> : vector<16x384xf32>
    %7 = tpu.matmul %6, %5, %cst {dimension_numbers = #tpu.dot_dimension_numbers<[1], [0], [0], [1], [0, 0, 1, 1], [], []>} : vector<16x128xbf16>, vector<128x384xbf16>, vector<16x384xf32> -> vector<16x384xf32>
    %c0_5 = arith.constant 0 : index
    %c0_6 = arith.constant 0 : index
    %c0_7 = arith.constant 0 : index
    %8 = vector.load %arg4[%c0_5, %c0_6, %c0_7] : memref<1x1x384xf32, #tpu.memory_space<vmem>>, vector<1x1x384xf32>
    %9 = vector.shape_cast %8 : vector<1x1x384xf32> to vector<1x384xf32>
    %10 = vector.broadcast %9 : vector<1x384xf32> to vector<16x384xf32>
    %11 = arith.addf %7, %10 : vector<16x384xf32>
    %12 = vector.extract_strided_slice %11 {offsets = [0, 0], sizes = [16, 128], strides = [1, 1]} : vector<16x384xf32> to vector<16x128xf32>
    %13 = vector.extract_strided_slice %11 {offsets = [0, 128], sizes = [16, 128], strides = [1, 1]} : vector<16x384xf32> to vector<16x128xf32>
    %14 = vector.extract_strided_slice %11 {offsets = [0, 256], sizes = [16, 128], strides = [1, 1]} : vector<16x384xf32> to vector<16x128xf32>
    %15 = vector.extract_strided_slice %12 {offsets = [0, 0], sizes = [8, 128], strides = [1, 1]} : vector<16x128xf32> to vector<8x128xf32>
    %16 = vector.extract_strided_slice %13 {offsets = [0, 0], sizes = [8, 128], strides = [1, 1]} : vector<16x128xf32> to vector<8x128xf32>
    %17 = arith.mulf %15, %16 : vector<8x128xf32>
    %18 = vector.extract_strided_slice %13 {offsets = [8, 0], sizes = [8, 128], strides = [1, 1]} : vector<16x128xf32> to vector<8x128xf32>
    %19 = arith.mulf %15, %18 : vector<8x128xf32>
    %20 = vector.extract_strided_slice %12 {offsets = [8, 0], sizes = [8, 128], strides = [1, 1]} : vector<16x128xf32> to vector<8x128xf32>
    %21 = vector.extract_strided_slice %13 {offsets = [0, 0], sizes = [8, 128], strides = [1, 1]} : vector<16x128xf32> to vector<8x128xf32>
    %22 = arith.mulf %20, %21 : vector<8x128xf32>
    %23 = vector.extract_strided_slice %13 {offsets = [8, 0], sizes = [8, 128], strides = [1, 1]} : vector<16x128xf32> to vector<8x128xf32>
    %24 = arith.mulf %20, %23 : vector<8x128xf32>
    %25 = tpu.concatenate %17, %19, %22, %24 in 0 : vector<8x128xf32>, vector<8x128xf32>, vector<8x128xf32>, vector<8x128xf32> -> vector<32x128xf32>
    %c0_8 = arith.constant 0 : index
    %c0_9 = arith.constant 0 : index
    %26 = vector.load %arg2[%c0_8, %c0_9] : memref<128x128xf32, #tpu.memory_space<vmem>>, vector<128x128xf32>
    %cst_10 = arith.constant dense<0.000000e+00> : vector<32x128xf32>
    %27 = tpu.matmul %25, %26, %cst_10 {dimension_numbers = #tpu.dot_dimension_numbers<[1], [0], [0], [1], [0, 0, 1, 1], [], []>} : vector<32x128xf32>, vector<128x128xf32>, vector<32x128xf32> -> vector<32x128xf32>
    %28 = vector.extract_strided_slice %27 {offsets = [0, 0], sizes = [8, 128], strides = [1, 1]} : vector<32x128xf32> to vector<8x128xf32>
    %29 = vector.extract_strided_slice %27 {offsets = [8, 0], sizes = [8, 128], strides = [1, 1]} : vector<32x128xf32> to vector<8x128xf32>
    %30 = arith.maximumf %28, %29 : vector<8x128xf32>
    %31 = arith.subf %28, %30 : vector<8x128xf32>
    %32 = math.exp %31 : vector<8x128xf32>
    %33 = arith.subf %29, %30 : vector<8x128xf32>
    %34 = math.exp %33 : vector<8x128xf32>
    %35 = vector.extract_strided_slice %14 {offsets = [0, 0], sizes = [8, 128], strides = [1, 1]} : vector<16x128xf32> to vector<8x128xf32>
    %36 = arith.mulf %32, %35 : vector<8x128xf32>
    %37 = arith.addf %32, %34 : vector<8x128xf32>
    %38 = vector.extract_strided_slice %14 {offsets = [8, 0], sizes = [8, 128], strides = [1, 1]} : vector<16x128xf32> to vector<8x128xf32>
    %39 = arith.mulf %34, %38 : vector<8x128xf32>
    %40 = arith.addf %36, %39 : vector<8x128xf32>
    %41 = arith.divf %40, %37 : vector<8x128xf32>
    %42 = vector.extract_strided_slice %27 {offsets = [16, 0], sizes = [8, 128], strides = [1, 1]} : vector<32x128xf32> to vector<8x128xf32>
    %43 = vector.extract_strided_slice %27 {offsets = [24, 0], sizes = [8, 128], strides = [1, 1]} : vector<32x128xf32> to vector<8x128xf32>
    %44 = arith.maximumf %42, %43 : vector<8x128xf32>
    %45 = arith.subf %42, %44 : vector<8x128xf32>
    %46 = math.exp %45 : vector<8x128xf32>
    %47 = arith.subf %43, %44 : vector<8x128xf32>
    %48 = math.exp %47 : vector<8x128xf32>
    %49 = vector.extract_strided_slice %14 {offsets = [0, 0], sizes = [8, 128], strides = [1, 1]} : vector<16x128xf32> to vector<8x128xf32>
    %50 = arith.mulf %46, %49 : vector<8x128xf32>
    %51 = arith.addf %46, %48 : vector<8x128xf32>
    %52 = vector.extract_strided_slice %14 {offsets = [8, 0], sizes = [8, 128], strides = [1, 1]} : vector<16x128xf32> to vector<8x128xf32>
    %53 = arith.mulf %48, %52 : vector<8x128xf32>
    %54 = arith.addf %50, %53 : vector<8x128xf32>
    %55 = arith.divf %54, %51 : vector<8x128xf32>
    %56 = tpu.concatenate %41, %55 in 0 : vector<8x128xf32>, vector<8x128xf32> -> vector<16x128xf32>
    %c0_11 = arith.constant 0 : index
    %c0_12 = arith.constant 0 : index
    %c0_13 = arith.constant 0 : index
    %57 = vector.load %arg5[%c0_11, %c0_12, %c0_13] : memref<1x128x128xbf16, #tpu.memory_space<vmem>>, vector<1x128x128xbf16>
    %58 = vector.shape_cast %57 : vector<1x128x128xbf16> to vector<128x128xbf16>
    %59 = arith.truncf %56 : vector<16x128xf32> to vector<16x128xbf16>
    %cst_14 = arith.constant dense<0.000000e+00> : vector<16x128xf32>
    %60 = tpu.matmul %59, %58, %cst_14 {dimension_numbers = #tpu.dot_dimension_numbers<[1], [0], [0], [1], [0, 0, 1, 1], [], []>} : vector<16x128xbf16>, vector<128x128xbf16>, vector<16x128xf32> -> vector<16x128xf32>
    %61 = arith.addf %3, %60 : vector<16x128xf32>
    %c0_15 = arith.constant 0 : index
    %c0_16 = arith.constant 0 : index
    %c0_17 = arith.constant 0 : index
    %62 = vector.load %arg6[%c0_15, %c0_16, %c0_17] : memref<1x1x128xf32, #tpu.memory_space<vmem>>, vector<1x1x128xf32>
    %63 = vector.shape_cast %62 : vector<1x1x128xf32> to vector<1x128xf32>
    %64 = vector.broadcast %63 : vector<1x128xf32> to vector<16x128xf32>
    %65 = arith.addf %61, %64 : vector<16x128xf32>
    %c0_18 = arith.constant 0 : index
    %c0_19 = arith.constant 0 : index
    %c0_20 = arith.constant 0 : index
    %66 = vector.load %arg7[%c0_18, %c0_19, %c0_20] : memref<1x1x128xf32, #tpu.memory_space<vmem>>, vector<1x1x128xf32>
    %67 = vector.shape_cast %66 : vector<1x1x128xf32> to vector<1x128xf32>
    %c0_21 = arith.constant 0 : index
    %c0_22 = arith.constant 0 : index
    %c0_23 = arith.constant 0 : index
    %68 = vector.load %arg8[%c0_21, %c0_22, %c0_23] : memref<1x1x128xf32, #tpu.memory_space<vmem>>, vector<1x1x128xf32>
    %69 = vector.shape_cast %68 : vector<1x1x128xf32> to vector<1x128xf32>
    %cst_24 = arith.constant dense<0.000000e+00> : vector<16xf32>
    %70 = vector.multi_reduction <add>, %65, %cst_24 [1] : vector<16x128xf32> to vector<16xf32>
    %71 = vector.shape_cast %70 : vector<16xf32> to vector<16x1xf32>
    %cst_25 = arith.constant 1.280000e+02 : f32
    %72 = vector.broadcast %cst_25 : f32 to vector<16x1xf32>
    %73 = arith.divf %71, %72 : vector<16x1xf32>
    %74 = vector.broadcast %73 : vector<16x1xf32> to vector<16x128xf32>
    %75 = arith.subf %65, %74 : vector<16x128xf32>
    %76 = arith.mulf %75, %75 : vector<16x128xf32>
    %cst_26 = arith.constant dense<0.000000e+00> : vector<16xf32>
    %77 = vector.multi_reduction <add>, %76, %cst_26 [1] : vector<16x128xf32> to vector<16xf32>
    %78 = vector.shape_cast %77 : vector<16xf32> to vector<16x1xf32>
    %cst_27 = arith.constant 1.280000e+02 : f32
    %79 = vector.broadcast %cst_27 : f32 to vector<16x1xf32>
    %80 = arith.divf %78, %79 : vector<16x1xf32>
    %81 = vector.broadcast %73 : vector<16x1xf32> to vector<16x128xf32>
    %82 = arith.subf %65, %81 : vector<16x128xf32>
    %cst_28 = arith.constant 9.99999974E-6 : f32
    %83 = vector.broadcast %cst_28 : f32 to vector<16x1xf32>
    %84 = arith.addf %80, %83 : vector<16x1xf32>
    %85 = math.rsqrt %84 : vector<16x1xf32>
    %86 = vector.broadcast %85 : vector<16x1xf32> to vector<16x128xf32>
    %87 = arith.mulf %82, %86 : vector<16x128xf32>
    %88 = vector.broadcast %67 : vector<1x128xf32> to vector<16x128xf32>
    %89 = arith.mulf %87, %88 : vector<16x128xf32>
    %90 = vector.broadcast %69 : vector<1x128xf32> to vector<16x128xf32>
    %91 = arith.addf %89, %90 : vector<16x128xf32>
    %c0_29 = arith.constant 0 : index
    %c0_30 = arith.constant 0 : index
    %c0_31 = arith.constant 0 : index
    %92 = vector.load %arg9[%c0_29, %c0_30, %c0_31] : memref<1x128x2048xbf16, #tpu.memory_space<vmem>>, vector<1x128x2048xbf16>
    %93 = vector.shape_cast %92 : vector<1x128x2048xbf16> to vector<128x2048xbf16>
    %94 = arith.truncf %91 : vector<16x128xf32> to vector<16x128xbf16>
    %cst_32 = arith.constant dense<0.000000e+00> : vector<16x2048xf32>
    %95 = tpu.matmul %94, %93, %cst_32 {dimension_numbers = #tpu.dot_dimension_numbers<[1], [0], [0], [1], [0, 0, 1, 1], [], []>} : vector<16x128xbf16>, vector<128x2048xbf16>, vector<16x2048xf32> -> vector<16x2048xf32>
    %c0_33 = arith.constant 0 : index
    %c0_34 = arith.constant 0 : index
    %c0_35 = arith.constant 0 : index
    %96 = vector.load %arg10[%c0_33, %c0_34, %c0_35] : memref<1x1x2048xf32, #tpu.memory_space<vmem>>, vector<1x1x2048xf32>
    %97 = vector.shape_cast %96 : vector<1x1x2048xf32> to vector<1x2048xf32>
    %98 = vector.broadcast %97 : vector<1x2048xf32> to vector<16x2048xf32>
    %99 = arith.addf %95, %98 : vector<16x2048xf32>
    %cst_36 = arith.constant 0.000000e+00 : f32
    %100 = vector.broadcast %cst_36 : f32 to vector<16x2048xf32>
    %101 = arith.maximumf %99, %100 : vector<16x2048xf32>
    %c0_37 = arith.constant 0 : index
    %c0_38 = arith.constant 0 : index
    %c0_39 = arith.constant 0 : index
    %102 = vector.load %arg11[%c0_37, %c0_38, %c0_39] : memref<1x2048x128xbf16, #tpu.memory_space<vmem>>, vector<1x2048x128xbf16>
    %103 = vector.shape_cast %102 : vector<1x2048x128xbf16> to vector<2048x128xbf16>
    %104 = arith.truncf %101 : vector<16x2048xf32> to vector<16x2048xbf16>
    %cst_40 = arith.constant dense<0.000000e+00> : vector<16x128xf32>
    %105 = tpu.matmul %104, %103, %cst_40 {dimension_numbers = #tpu.dot_dimension_numbers<[1], [0], [0], [1], [0, 0, 1, 1], [], []>} : vector<16x2048xbf16>, vector<2048x128xbf16>, vector<16x128xf32> -> vector<16x128xf32>
    %106 = arith.addf %91, %105 : vector<16x128xf32>
    %c0_41 = arith.constant 0 : index
    %c0_42 = arith.constant 0 : index
    %c0_43 = arith.constant 0 : index
    %107 = vector.load %arg12[%c0_41, %c0_42, %c0_43] : memref<1x1x128xf32, #tpu.memory_space<vmem>>, vector<1x1x128xf32>
    %108 = vector.shape_cast %107 : vector<1x1x128xf32> to vector<1x128xf32>
    %109 = vector.broadcast %108 : vector<1x128xf32> to vector<16x128xf32>
    %110 = arith.addf %106, %109 : vector<16x128xf32>
    %c0_44 = arith.constant 0 : index
    %c0_45 = arith.constant 0 : index
    %c0_46 = arith.constant 0 : index
    %111 = vector.load %arg13[%c0_44, %c0_45, %c0_46] : memref<1x1x128xf32, #tpu.memory_space<vmem>>, vector<1x1x128xf32>
    %112 = vector.shape_cast %111 : vector<1x1x128xf32> to vector<1x128xf32>
    %c0_47 = arith.constant 0 : index
    %c0_48 = arith.constant 0 : index
    %c0_49 = arith.constant 0 : index
    %113 = vector.load %arg14[%c0_47, %c0_48, %c0_49] : memref<1x1x128xf32, #tpu.memory_space<vmem>>, vector<1x1x128xf32>
    %114 = vector.shape_cast %113 : vector<1x1x128xf32> to vector<1x128xf32>
    %cst_50 = arith.constant dense<0.000000e+00> : vector<16xf32>
    %115 = vector.multi_reduction <add>, %110, %cst_50 [1] : vector<16x128xf32> to vector<16xf32>
    %116 = vector.shape_cast %115 : vector<16xf32> to vector<16x1xf32>
    %cst_51 = arith.constant 1.280000e+02 : f32
    %117 = vector.broadcast %cst_51 : f32 to vector<16x1xf32>
    %118 = arith.divf %116, %117 : vector<16x1xf32>
    %119 = vector.broadcast %118 : vector<16x1xf32> to vector<16x128xf32>
    %120 = arith.subf %110, %119 : vector<16x128xf32>
    %121 = arith.mulf %120, %120 : vector<16x128xf32>
    %cst_52 = arith.constant dense<0.000000e+00> : vector<16xf32>
    %122 = vector.multi_reduction <add>, %121, %cst_52 [1] : vector<16x128xf32> to vector<16xf32>
    %123 = vector.shape_cast %122 : vector<16xf32> to vector<16x1xf32>
    %cst_53 = arith.constant 1.280000e+02 : f32
    %124 = vector.broadcast %cst_53 : f32 to vector<16x1xf32>
    %125 = arith.divf %123, %124 : vector<16x1xf32>
    %126 = vector.broadcast %118 : vector<16x1xf32> to vector<16x128xf32>
    %127 = arith.subf %110, %126 : vector<16x128xf32>
    %cst_54 = arith.constant 9.99999974E-6 : f32
    %128 = vector.broadcast %cst_54 : f32 to vector<16x1xf32>
    %129 = arith.addf %125, %128 : vector<16x1xf32>
    %130 = math.rsqrt %129 : vector<16x1xf32>
    %131 = vector.broadcast %130 : vector<16x1xf32> to vector<16x128xf32>
    %132 = arith.mulf %127, %131 : vector<16x128xf32>
    %133 = vector.broadcast %112 : vector<1x128xf32> to vector<16x128xf32>
    %134 = arith.mulf %132, %133 : vector<16x128xf32>
    %135 = vector.broadcast %114 : vector<1x128xf32> to vector<16x128xf32>
    %136 = arith.addf %134, %135 : vector<16x128xf32>
    %c0_55 = arith.constant 0 : index
    %c0_56 = arith.constant 0 : index
    %137 = vector.load %arg18[%c0_55, %c0_56] : memref<16x128xf32, #tpu.memory_space<vmem>>, vector<16x128xf32>
    tpu.vector_store %arg18[%c0_55, %c0_56], %136 {strides = array<i32>} : memref<16x128xf32, #tpu.memory_space<vmem>>, vector<16x128xf32>,
    %c1_i32 = arith.constant 1 : i32
    %138 = arith.cmpi eq, %arg0, %c1_i32 : i32
    %139 = arith.extui %138 : i1 to i32
    %c0_i32_57 = arith.constant 0 : i32
    %140 = arith.cmpi ne, %139, %c0_i32_57 : i32
    scf.if %140 {
      %c0_58 = arith.constant 0 : index
      %c0_59 = arith.constant 0 : index
      %141 = vector.load %arg15[%c0_58, %c0_59] : memref<1x128xf32, #tpu.memory_space<vmem>>, vector<1x128xf32>
      %c0_60 = arith.constant 0 : index
      %c0_61 = arith.constant 0 : index
      %142 = vector.load %arg16[%c0_60, %c0_61] : memref<1x128xf32, #tpu.memory_space<vmem>>, vector<1x128xf32>
      %cst_62 = arith.constant dense<0.000000e+00> : vector<16xf32>
      %143 = vector.multi_reduction <add>, %136, %cst_62 [1] : vector<16x128xf32> to vector<16xf32>
      %144 = vector.shape_cast %143 : vector<16xf32> to vector<16x1xf32>
      %cst_63 = arith.constant 1.280000e+02 : f32
      %145 = vector.broadcast %cst_63 : f32 to vector<16x1xf32>
      %146 = arith.divf %144, %145 : vector<16x1xf32>
      %147 = vector.broadcast %146 : vector<16x1xf32> to vector<16x128xf32>
      %148 = arith.subf %136, %147 : vector<16x128xf32>
      %149 = arith.mulf %148, %148 : vector<16x128xf32>
      %cst_64 = arith.constant dense<0.000000e+00> : vector<16xf32>
      %150 = vector.multi_reduction <add>, %149, %cst_64 [1] : vector<16x128xf32> to vector<16xf32>
      %151 = vector.shape_cast %150 : vector<16xf32> to vector<16x1xf32>
      %cst_65 = arith.constant 1.280000e+02 : f32
      %152 = vector.broadcast %cst_65 : f32 to vector<16x1xf32>
      %153 = arith.divf %151, %152 : vector<16x1xf32>
      %154 = vector.broadcast %146 : vector<16x1xf32> to vector<16x128xf32>
      %155 = arith.subf %136, %154 : vector<16x128xf32>
      %cst_66 = arith.constant 9.99999974E-6 : f32
      %156 = vector.broadcast %cst_66 : f32 to vector<16x1xf32>
      %157 = arith.addf %153, %156 : vector<16x1xf32>
      %158 = math.rsqrt %157 : vector<16x1xf32>
      %159 = vector.broadcast %158 : vector<16x1xf32> to vector<16x128xf32>
      %160 = arith.mulf %155, %159 : vector<16x128xf32>
      %161 = vector.broadcast %141 : vector<1x128xf32> to vector<16x128xf32>
      %162 = arith.mulf %160, %161 : vector<16x128xf32>
      %163 = vector.broadcast %142 : vector<1x128xf32> to vector<16x128xf32>
      %164 = arith.addf %162, %163 : vector<16x128xf32>
      %c0_67 = arith.constant 0 : index
      %c0_68 = arith.constant 0 : index
      %165 = vector.load %arg17[%c0_67, %c0_68] : memref<16x128xf32, #tpu.memory_space<vmem>>, vector<16x128xf32>
      tpu.vector_store %arg17[%c0_67, %c0_68], %164 {strides = array<i32>} : memref<16x128xf32, #tpu.memory_space<vmem>>, vector<16x128xf32>,
    } else {
    }
    return
  }
  func.func @transform_0(%arg0: i32) -> (i32, i32) {
    %c0_i32 = arith.constant 0 : i32
    %c0_i32_0 = arith.constant 0 : i32
    %c0_i32_1 = arith.constant 0 : i32
    return %c0_i32, %c0_i32_0 : i32, i32
  }
  func.func @transform_1(%arg0: i32) -> (i32, i32) {
    %c0_i32 = arith.constant 0 : i32
    %c0_i32_0 = arith.constant 0 : i32
    %c0_i32_1 = arith.constant 0 : i32
    return %c0_i32, %c0_i32_0 : i32, i32
  }
  func.func @transform_2(%arg0: i32) -> (i32, i32, i32) {
    %c0_i32 = arith.constant 0 : i32
    %c0_i32_0 = arith.constant 0 : i32
    %c0_i32_1 = arith.constant 0 : i32
    return %arg0, %c0_i32, %c0_i32_0 : i32, i32, i32
  }
  func.func @transform_3(%arg0: i32) -> (i32, i32, i32) {
    %c0_i32 = arith.constant 0 : i32
    %c0_i32_0 = arith.constant 0 : i32
    %c0_i32_1 = arith.constant 0 : i32
    return %arg0, %c0_i32, %c0_i32_0 : i32, i32, i32
  }
  func.func @transform_4(%arg0: i32) -> (i32, i32, i32) {
    %c0_i32 = arith.constant 0 : i32
    %c0_i32_0 = arith.constant 0 : i32
    %c0_i32_1 = arith.constant 0 : i32
    return %arg0, %c0_i32, %c0_i32_0 : i32, i32, i32
  }
  func.func @transform_5(%arg0: i32) -> (i32, i32, i32) {
    %c0_i32 = arith.constant 0 : i32
    %c0_i32_0 = arith.constant 0 : i32
    %c0_i32_1 = arith.constant 0 : i32
    return %arg0, %c0_i32, %c0_i32_0 : i32, i32, i32
  }
  func.func @transform_6(%arg0: i32) -> (i32, i32, i32) {
    %c0_i32 = arith.constant 0 : i32
    %c0_i32_0 = arith.constant 0 : i32
    %c0_i32_1 = arith.constant 0 : i32
    return %arg0, %c0_i32, %c0_i32_0 : i32, i32, i32
  }
  func.func @transform_7(%arg0: i32) -> (i32, i32, i32) {
    %c0_i32 = arith.constant 0 : i32
    %c0_i32_0 = arith.constant 0 : i32
    %c0_i32_1 = arith.constant 0 : i32
    return %arg0, %c0_i32, %c0_i32_0 : i32, i32, i32
  }
  func.func @transform_8(%arg0: i32) -> (i32, i32, i32) {
    %c0_i32 = arith.constant 0 : i32
    %c0_i32_0 = arith.constant 0 : i32
    %c0_i32_1 = arith.constant 0 : i32
    return %arg0, %c0_i32, %c0_i32_0 : i32, i32, i32
  }
  func.func @transform_9(%arg0: i32) -> (i32, i32, i32) {
    %c0_i32 = arith.constant 0 : i32
    %c0_i32_0 = arith.constant 0 : i32
    %c0_i32_1 = arith.constant 0 : i32
    return %arg0, %c0_i32, %c0_i32_0 : i32, i32, i32
  }
  func.func @transform_10(%arg0: i32) -> (i32, i32, i32) {
    %c0_i32 = arith.constant 0 : i32
    %c0_i32_0 = arith.constant 0 : i32
    %c0_i32_1 = arith.constant 0 : i32
    return %arg0, %c0_i32, %c0_i32_0 : i32, i32, i32
  }
  func.func @transform_11(%arg0: i32) -> (i32, i32, i32) {
    %c0_i32 = arith.constant 0 : i32
    %c0_i32_0 = arith.constant 0 : i32
    %c0_i32_1 = arith.constant 0 : i32
    return %arg0, %c0_i32, %c0_i32_0 : i32, i32, i32
  }
  func.func @transform_12(%arg0: i32) -> (i32, i32, i32) {
    %c0_i32 = arith.constant 0 : i32
    %c0_i32_0 = arith.constant 0 : i32
    %c0_i32_1 = arith.constant 0 : i32
    return %arg0, %c0_i32, %c0_i32_0 : i32, i32, i32
  }
  func.func @transform_13(%arg0: i32) -> (i32, i32, i32) {
    %c0_i32 = arith.constant 0 : i32
    %c0_i32_0 = arith.constant 0 : i32
    %c0_i32_1 = arith.constant 0 : i32
    return %arg0, %c0_i32, %c0_i32_0 : i32, i32, i32
  }
  func.func @transform_14(%arg0: i32) -> (i32, i32) {
    %c0_i32 = arith.constant 0 : i32
    %c0_i32_0 = arith.constant 0 : i32
    %c0_i32_1 = arith.constant 0 : i32
    return %c0_i32, %c0_i32_0 : i32, i32
  }
  func.func @transform_15(%arg0: i32) -> (i32, i32) {
    %c0_i32 = arith.constant 0 : i32
    %c0_i32_0 = arith.constant 0 : i32
    %c0_i32_1 = arith.constant 0 : i32
    return %c0_i32, %c0_i32_0 : i32, i32
  }
  func.func @transform_16(%arg0: i32) -> (i32, i32) {
    %c0_i32 = arith.constant 0 : i32
    %c0_i32_0 = arith.constant 0 : i32
    %c0_i32_1 = arith.constant 0 : i32
    return %c0_i32, %c0_i32_0 : i32, i32
  }
}

</mosaic_0001>

<bundles_post_ra>
// kernel: drc_forward.3
= control target key start
LH: loop header
LB: loop body
LE: loop exit
PB: predicated region body
PF: predicated region fallthrough
CT: control target
= control target key end

     0   :  { %s594_s9 = smov 0   ;;  %s596_s10 = smov 0   ;;  %s682_s0 = inlined_call_operand.vmem [shape: f32[16,128], index: 0, kind: input, shape index: {}]   ;;  %s683_s1 = inlined_call_operand.vmem [shape: bf16[128,512], index: 1, kind: input, shape index: {}]   ;;  %s684_s2 = inlined_call_operand.vmem [shape: f32[16,512], index: 2, kind: output, shape index: {}]  }
   0x1   :  { %s598_s11 = smov 0  }
   0x2 LB: > { %s472_s12 = sadd.s32 4294967295, %s576_s11   ;;  %s611_s13 = sadd.s32 1, %s576_s11   ;;  %s576_s11 = sphi %s598_s11, %s688_s11   ;;  %s572_s10 = sphi %s596_s10, %s687_s10   ;;  %s568_s9 = sphi %s594_s9, %s686_s9  }
   0x3   : > { %s37_s14 = ssub.s32 %s576_s11, %s611_s13  ;;  %s40_s15 = sadd.s32 1, %s572_s10 }
   0x4   : > { %p38_p0 = scmp.eq.s32.totalorder %s37_s14, 0  ;;  %p47_p1 = scmp.ne.s32.totalorder %s572_s10, %s568_s9 }
   0x5   : > { %p48_p2 = scmp.eq.s32.totalorder %s576_s11, 0  ;;  %p77_p3 = scmp.eq.s32.totalorder %s472_s12, 1 }
   0x6   : > { %s622_s16 = scalar_select %p38_p0, %s572_s10, %s40_s15  }
   0x7   : > { %p49_p4 = por %p48_p2, %p47_p1  ;;  %p624_p5 = por %p77_p3, %p47_p1 }
   0x8   : > { %p475_p6 = scmp.ge.s32.totalorder %s576_s11, 2 }
   0xa   : > { %102 = sbr.rel (%p475_p6) target bundleno = 27 (0x1b), region = 20 }
   0xf   : > { %105 = sbr.rel (!%p49_p4) target bundleno = 27 (0x1b), region = 24  ;;  %s107_s18 = sand.u32 (%p49_p4), 1, %s572_s10  }
  0x10   : > { %s503_s19 = sshll.u32 (%p49_p4), %s576_s11, 3  ;;  %s476_s20 = sshll.u32 (%p49_p4), %s107_s18, 7 }
  0x11   : > { %s634_s23 = scalar_lea.vmem (%p49_p4), %s683_s1, %s503_s19  ;;  %s109_s24 = scalar_lea.vmem (%p49_p4), [#allocation2], %s476_s20 }
  0x12   : > { %v171_v0 = vld [vmem:[%s634_s23] sm:$0xff] (%p49_p4)  ;;  %v173_v1 = vld [vmem:[%s634_s23 + $0x10] sm:$0xff] (%p49_p4) }
  0x13   : > { %v175_v2 = vld [vmem:[%s634_s23 + $0x20] sm:$0xff] (%p49_p4)  ;;  %172 = vst [vmem:[%s109_s24] sm:$0xff] (%p49_p4), %v171_v0  ;;  %174 = vst [vmem:[%s109_s24 + $0x8] sm:$0xff] (%p49_p4), %v173_v1  ;;  %v177_v3 = vld [vmem:[%s634_s23 + $0x30] sm:$0xff] (%p49_p4) }
  0x14   : > { %176 = vst [vmem:[%s109_s24 + $0x10] sm:$0xff] %v175_v2  ;;  %v179_v4 = vld [vmem:[%s634_s23 + $0x40] sm:$0xff]  ;;  %v181_v5 = vld [vmem:[%s634_s23 + $0x50] sm:$0xff]  ;;  %178 = vst [vmem:[%s109_s24 + $0x18] sm:$0xff] %v177_v3 }
  0x15   : > { %180 = vst [vmem:[%s109_s24 + $0x20] sm:$0xff] %v179_v4  ;;  %182 = vst [vmem:[%s109_s24 + $0x28] sm:$0xff] %v181_v5  ;;  %v183_v6 = vld [vmem:[%s634_s23 + $0x60] sm:$0xff]  ;;  %v185_v7 = vld [vmem:[%s634_s23 + $0x70] sm:$0xff] }
  0x16   : > { %v187_v8 = vld [vmem:[%s634_s23 + $0x80] sm:$0xff]  ;;  %184 = vst [vmem:[%s109_s24 + $0x30] sm:$0xff] %v183_v6  ;;  %186 = vst [vmem:[%s109_s24 + $0x38] sm:$0xff] %v185_v7  ;;  %v189_v9 = vld [vmem:[%s634_s23 + $0x90] sm:$0xff] }
  0x17   : > { %188 = vst [vmem:[%s109_s24 + $0x40] sm:$0xff] %v187_v8  ;;  %v191_v10 = vld [vmem:[%s634_s23 + $0xa0] sm:$0xff]  ;;  %v193_v11 = vld [vmem:[%s634_s23 + $0xb0] sm:$0xff]  ;;  %190 = vst [vmem:[%s109_s24 + $0x48] sm:$0xff] %v189_v9 }
  0x18   : > { %192 = vst [vmem:[%s109_s24 + $0x50] sm:$0xff] %v191_v10  ;;  %194 = vst [vmem:[%s109_s24 + $0x58] sm:$0xff] %v193_v11  ;;  %v195_v12 = vld [vmem:[%s634_s23 + $0xc0] sm:$0xff]  ;;  %v197_v13 = vld [vmem:[%s634_s23 + $0xd0] sm:$0xff] }
  0x19   : > { %v199_v14 = vld [vmem:[%s634_s23 + $0xe0] sm:$0xff]  ;;  %196 = vst [vmem:[%s109_s24 + $0x60] sm:$0xff] %v195_v12  ;;  %198 = vst [vmem:[%s109_s24 + $0x68] sm:$0xff] %v197_v13  ;;  %v201_v15 = vld [vmem:[%s634_s23 + $0xf0] sm:$0xff] }
  0x1a   : > { %200 = vst [vmem:[%s109_s24 + $0x70] sm:$0xff] %v199_v14  ;;  %202 = vst [vmem:[%s109_s24 + $0x78] sm:$0xff] %v201_v15 }
  0x1b PF: > { %p479_p7 = scmp.ge.s32.totalorder %s576_s11, 1  ;;  %p207_p8 = scmp.lt.s32.totalorder %s576_s11, 3 }
  0x1d   : > { %p208_p9 = pnand %p479_p7, %p207_p8 }
  0x1e   : > { %s214_s25 = sand.u32 (!%p208_p9), 1, %s568_s9  }
  0x1f   : > { %211 = sbr.rel (%p208_p9) target bundleno = 277 (0x115), region = 62  ;;  %s480_s26 = sshll.u32 (!%p208_p9), %s214_s25, 7 }
  0x20   : > { %s216_s27 = scalar_lea.vmem (!%p208_p9), [#allocation2], %s480_s26  ;;  %s481_s4 = sshll.u32 (!%p208_p9), %s214_s25, 5 }
  0x21   : > { %s233_s5 = scalar_lea.vmem (!%p208_p9), [#allocation3], %s481_s4 }
  0x24   : > { %v578_v16 = vmov 0   ;;  %v530_v17 = vld [vmem:[%s216_s27 + $0x74] ss:$8 sps:$4 sm:$0xff]   ;;  %v532_v18 = vld [vmem:[%s216_s27 + $0x70] ss:$8 sps:$4 sm:$0xff]   ;;  %v237_v33 = vld [vmem:[%s682_s0] sm:$0xff] }
  0x25   : > { %368 = vmatprep.mubr.bf16.mxu0 %v578_v16  ;;  %336 = vmatprep.subr.bf16.mxu0 %v530_v17  ;;  %v533_v19 = vld [vmem:[%s216_s27 + $0x64] ss:$8 sps:$4 sm:$0xff]   ;;  %v535_v20 = vld [vmem:[%s216_s27 + $0x60] ss:$8 sps:$4 sm:$0xff]   ;;  %v536_v21 = vld [vmem:[%s216_s27 + $0x54] ss:$8 sps:$4 sm:$0xff]  }
  0x26   : > { %337 = vmatpush1.bf16.msra.mxu0 %v532_v18  ;;  %v538_v22 = vld [vmem:[%s216_s27 + $0x50] ss:$8 sps:$4 sm:$0xff]   ;;  %v539_v23 = vld [vmem:[%s216_s27 + $0x44] ss:$8 sps:$4 sm:$0xff]   ;;  %v541_v24 = vld [vmem:[%s216_s27 + $0x40] ss:$8 sps:$4 sm:$0xff]  }
  0x27   : > { %338 = vmatprep.subr.bf16.mxu0 %v533_v19  ;;  %v542_v25 = vld [vmem:[%s216_s27 + $0x34] ss:$8 sps:$4 sm:$0xff]   ;;  %v544_v26 = vld [vmem:[%s216_s27 + $0x30] ss:$8 sps:$4 sm:$0xff]   ;;  %v545_v27 = vld [vmem:[%s216_s27 + $0x24] ss:$8 sps:$4 sm:$0xff]  }
  0x28   : > { %v547_v28 = vld [vmem:[%s216_s27 + $0x20] ss:$8 sps:$4 sm:$0xff]   ;;  %v548_v29 = vld [vmem:[%s216_s27 + $0x14] ss:$8 sps:$4 sm:$0xff]   ;;  %v550_v30 = vld [vmem:[%s216_s27 + $0x10] ss:$8 sps:$4 sm:$0xff]  }
  0x29   : > { %v551_v31 = vld [vmem:[%s216_s27 + $0x4] ss:$8 sps:$4 sm:$0xff]   ;;  %v553_v32 = vld [vmem:[%s216_s27] ss:$8 sps:$4 sm:$0xff]   ;;  %s504_s6 = sshll.u32 (%p624_p5), %s472_s12, 4 }
  0x2a   : > { %339 = vmatpush1.bf16.msra.mxu0 %v535_v20  ;;  %v238_v34 = vld [vmem:[%s682_s0 + $0x8] sm:$0xff]  ;;  %s392_s9 = scalar_lea.vmem (%p624_p5), %s684_s2, %s504_s6 }
  0x2b   : > { %340 = vmatprep.subr.bf16.mxu0 %v536_v21  ;;  %v239_v35 = vpack.c.bf16 %v238_v34, %v237_v33 }
  0x2e   : > { %341 = vmatpush1.bf16.msra.mxu0 %v538_v22 }
  0x2f   : > { %342 = vmatprep.subr.bf16.mxu0 %v539_v23 }
  0x32   : > { %343 = vmatpush1.bf16.msra.mxu0 %v541_v24 }
  0x33   : > { %344 = vmatprep.subr.bf16.mxu0 %v542_v25 }
  0x36   : > { %345 = vmatpush1.bf16.msra.mxu0 %v544_v26 }
  0x37   : > { %346 = vmatprep.subr.bf16.mxu0 %v545_v27 }
  0x3a   : > { %347 = vmatpush1.bf16.msra.mxu0 %v547_v28 }
  0x3b   : > { %348 = vmatprep.subr.bf16.mxu0 %v548_v29 }
  0x3e   : > { %349 = vmatpush1.bf16.msra.mxu0 %v550_v30 }
  0x3f   : > { %350 = vmatprep.subr.bf16.mxu0 %v551_v31 }
  0x42   : > { %351 = vmatpush1.bf16.msra.mxu0 %v553_v32 }
  0x45   : > { %369 = vmatmul.mubr.bf16.vlgmr.msra.gmra.mxu0 %v239_v35 }
 0x105   : > { %v370_v36 = vpop.f32.mrf.mxu0 }
 0x106   : > { %379 = vst [vmem:[%s233_s5] sm:$0xff] %v370_v36 }
 0x107   : > { %v372_v37 = vpop.f32.mrf.mxu0 }
 0x108   : > { %380 = vst [vmem:[%s233_s5 + $0x8] sm:$0xff] %v372_v37  ;;  %389 = sbr.rel (!%p624_p5) target bundleno = 277 (0x115), region = 70 }
 0x109   : > { %v374_v38 = vpop.f32.mrf.mxu0 }
 0x10a   : > { %381 = vst [vmem:[%s233_s5 + $0x10] sm:$0xff] %v374_v38 }
 0x10b   : > { %v376_v39 = vpop.f32.mrf.mxu0 }
 0x10c   : > { %382 = vst [vmem:[%s233_s5 + $0x18] sm:$0xff] %v376_v39 }
 0x10d   : > { %v405_v40 = vld [vmem:[%s233_s5] sm:$0xff] }
 0x10e   : > { %406 = vst [vmem:[%s392_s9] sm:$0xff] %v405_v40 }
 0x10f   : > { %v407_v41 = vld [vmem:[%s233_s5 + $0x8] sm:$0xff] }
 0x110   : > { %408 = vst [vmem:[%s392_s9 + $0x8] sm:$0xff] %v407_v41 }
 0x111   : > { %v409_v42 = vld [vmem:[%s233_s5 + $0x10] sm:$0xff] }
 0x112   : > { %410 = vst [vmem:[%s392_s9 + $0x20] sm:$0xff] %v409_v42 }
 0x113   : > { %v411_v43 = vld [vmem:[%s233_s5 + $0x18] sm:$0xff] }
 0x114   : > { %412 = vst [vmem:[%s392_s9 + $0x28] sm:$0xff] %v411_v43 }
 0x115 PF: > { %p9_p10 = scmp.ge.s32.totalorder %s611_s13, 4   ;;  %s686_s9 = smov %s572_s10 }
 0x116   : > { %s687_s10 = smov %s622_s16  ;;  %s688_s11 = smov %s611_s13 }
 0x117   :  { %11 = sbr.rel (!%p9_p10) target bundleno = 2 (0x2), region = 124 }

// kernel: drc_forward.2
= control target key start
LH: loop header
LB: loop body
LE: loop exit
PB: predicated region body
PF: predicated region fallthrough
CT: control target
= control target key end

     0   :  { %s6022_s0 = inlined_call_operand.vmem [shape: f32[16,128], index: 0, kind: input, shape index: {}]   ;;  %s6023_s1 = inlined_call_operand.vmem [shape: f32[128,128], index: 1, kind: input, shape index: {}]   ;;  %s6024_s2 = inlined_call_operand.hbm [shape: bf16[2,128,384], index: 2, kind: input, shape index: {}]   ;;  %s6025_s3 = inlined_call_operand.vmem [shape: f32[2,1,384], index: 3, kind: input, shape index: {}]   ;;  %s6026_s4 = inlined_call_operand.vmem [shape: bf16[2,128,128], index: 4, kind: input, shape index: {}]   ;;  %s6027_s5 = inlined_call_operand.vmem [shape: f32[2,1,128], index: 5, kind: input, shape index: {}]   ;;  %s6028_s6 = inlined_call_operand.vmem [shape: f32[2,1,128], index: 6, kind: input, shape index: {}]   ;;  %s6029_s7 = inlined_call_operand.vmem [shape: f32[2,1,128], index: 7, kind: input, shape index: {}]   ;;  %s6030_s8 = inlined_call_operand.hbm [shape: bf16[2,128,2048], index: 8, kind: input, shape index: {}]   ;;  %s6031_s9 = inlined_call_operand.vmem [shape: f32[2,1,2048], index: 9, kind: input, shape index: {}]   ;;  %s6032_s10 = inlined_call_operand.hbm [shape: bf16[2,2048,128], index: 10, kind: input, shape index: {}]   ;;  %s6033_s11 = inlined_call_operand.vmem [shape: f32[2,1,128], index: 11, kind: input, shape index: {}]   ;;  %s6034_s12 = inlined_call_operand.vmem [shape: f32[2,1,128], index: 12, kind: input, shape index: {}]   ;;  %s6035_s13 = inlined_call_operand.vmem [shape: f32[2,1,128], index: 13, kind: input, shape index: {}]   ;;  %s6036_s14 = inlined_call_operand.vmem [shape: f32[1,128], index: 14, kind: input, shape index: {}]   ;;  %s6037_s15 = inlined_call_operand.vmem [shape: f32[1,128], index: 15, kind: input, shape index: {}]   ;;  %s6038_s16 = inlined_call_operand.vmem [shape: f32[16,128], index: 16, kind: output, shape index: {}]  }
   0x1   :  { %6049 = sst [smem:[#allocation13_spill]] %s6022_s0 }
   0x2   :  { %6050 = sst [smem:[#allocation14_spill]] %s6023_s1 }
   0x3   :  { %6051 = sst [smem:[#allocation15_spill]] %s6024_s2 }
   0x4   :  { %6052 = sst [smem:[#allocation16_spill]] %s6025_s3 }
   0x5   :  { %6053 = sst [smem:[#allocation17_spill]] %s6026_s4 }
   0x6   :  { %6054 = sst [smem:[#allocation18_spill]] %s6030_s8 }
   0x7   :  { %6055 = sst [smem:[#allocation19_spill]] %s6032_s10 }
   0x8   :  { %6056 = sst [smem:[#allocation20_spill]] %s6034_s12 }
   0x9   :  { %6057 = sst [smem:[#allocation21_spill]] %s6035_s13 }
   0xa   :  { %6058 = sst [smem:[#allocation22_spill]] %s6036_s14 }
   0xb   :  { %6059 = sst [smem:[#allocation23_spill]] %s6037_s15 }
   0xc   :  { %6060 = sst [smem:[#allocation24_spill]] %s6038_s16 }
   0xd   :  { %21 = vsyncpa [#allocation4], 0 }
   0xe   :  { %23 = vsyncpa [#allocation4 + $0x1], 0 }
   0xf   :  { %24 = vsyncpa [#allocation6], 0 }
  0x10   :  { %26 = vsyncpa [#allocation6 + $0x1], 0  ;;  %s5256_s21 = smov 0   ;;  %s5258_s22 = smov 0  }
  0x11   :  { %s5260_s23 = smov 0   ;;  %s5262_s24 = smov 0  }
  0x12 LB: > { %6061 = sst [smem:[#allocation10_spill]] %s5154_s23  ;;  %s5275_s25 = sadd.s32 4294967295, %s5158_s24   ;;  %s5158_s24 = sphi %s5262_s24, %s6090_s24   ;;  %s5154_s23 = sphi %s5260_s23, %s6092_s23   ;;  %s5150_s22 = sphi %s5258_s22, %s6094_s22   ;;  %s5146_s21 = sphi %s5256_s21, %s6093_s21  }
  0x13   : > { %s5278_s26 = sadd.s32 1, %s5158_s24   ;;  %s81_s28 = sadd.s32 1, %s5154_s23 }
  0x14   : > { %6062 = sst [smem:[#allocation11_spill]] %s5278_s26  ;;  %s78_s27 = ssub.s32 %s5158_s24, %s5278_s26 }
  0x15   : > { %p79_p0 = scmp.eq.s32.totalorder %s78_s27, 0  ;;  %p88_p1 = scmp.ne.s32.totalorder %s5154_s23, %s5150_s22 }
  0x16   : > { %p89_p2 = scmp.eq.s32.totalorder %s5158_s24, 0  ;;  %p94_p3 = scmp.ne.s32.totalorder %s5150_s22, %s5146_s21 }
  0x17   : > { %s5288_s29 = scalar_select %p79_p0, %s5154_s23, %s81_s28  }
  0x18   : > { %p90_p4 = por %p89_p2, %p88_p1  ;;  %p95_p5 = scmp.eq.s32.totalorder %s5275_s25, 0 }
  0x19   : > { %6063 = sst [smem:[#allocation12_spill]] %s5288_s29  ;;  %p4803_p6 = scmp.lt.s32.totalorder %s5158_s24, 2 }
  0x1a   : > { %p5292_p7 = por %p95_p5, %p94_p3  ;;  %s5297_s0 = sand.u32 1, %s5154_s23  }
  0x1b   : > { %p5299_p8 = pnand %p4803_p6, %p90_p4  ;;  %s533_s18 = sand.u32 1, %s5158_s24  }
  0x1c   : > { %s6064_s30 = scalar_select %p5292_p7, 1, 0 }
  0x1d   : > { %s6044_s19 = sshll.u32 %s5297_s0, 10  ;;  %s6045_s20 = sshll.u32 %s5158_s24, 14 }
  0x1e   : > { %s537_s21 = scalar_lea.vmem [#allocation5], %s6044_s19  ;;  %s6066_s8 = sld [smem:[#allocation18_spill]] }
  0x1f   : > { %s544_s27 = sshll.u32 %s537_s21, 4  ;;  %s5317_s23 = scalar_lea.sflag [#allocation6], %s533_s18  ;;  %s5315_s27 = int_to_ptr.vmem [resolvable:$true] %s544_s27 }
  0x20   : > { %p5323_p10 = pneg %p5299_p8 }
  0x24   : > { %s5313_s26 = scalar_lea.hbm %s6066_s8, %s6045_s20  ;;  %s5041_s28 = scalar_lea.hbm %s6066_s8, 32768 }
  0x25   : > { %s5036_s16 = scalar_lea.hbm %s5313_s26, 16384  ;;  %p5042_p13 = scmp.lt.s32.totalorder %s5313_s26, %s6066_s8 }
  0x26   : > { %p5037_p9 = scmp.ne.s32.totalorder %s5313_s26, %s5036_s16  ;;  %p5043_p0 = scmp.lt.s32.totalorder %s5041_s28, %s5036_s16 }
  0x28   : > { %p5039_p11 = pnand %p5323_p10, %p5037_p9  ;;  %p5044_p1 = por %p5043_p0, %p5042_p13 }
  0x2a   : > { %p5040_p12 = pneg %p5039_p11 }
  0x2c   : > { %p5045_p2 = pnand %p5044_p1, %p5040_p12 }
  0x2e   : > { %5048 = shalt.err (!%p5045_p2)
}
  0x2f   : > { %s5049_s18 = scalar_lea.vmem %s5315_s27, 16384  ;;  %s5160_s14 = smov [#allocation5]  }
  0x30   : > { %p5050_p3 = scmp.ne.s32.totalorder %s5315_s27, %s5049_s18  ;;  %s5054_s29 = sshll.u32 %s5160_s14, 4  ;;  %s5055_s29 = int_to_ptr.vmem [resolvable:$false] %s5054_s29 }
  0x31   : > { %s5056_s21 = scalar_lea.vmem %s5055_s29, 32768  ;;  %p5057_p6 = scmp.lt.s32.totalorder %s5315_s27, %s5055_s29 }
  0x32   : > { %p5052_p4 = pnand %p5050_p3, %p5323_p10  ;;  %p5058_p9 = scmp.lt.s32.totalorder %s5056_s21, %s5049_s18 }
  0x34   : > { %p5053_p5 = pneg %p5052_p4  ;;  %p5059_p11 = por %p5058_p9, %p5057_p6 }
  0x36   : > { %p5060_p7 = pnand %p5059_p11, %p5053_p5 }
  0x38   : > { %5063 = shalt.err (!%p5060_p7)
}
  0x39   : > { %s5161_s16 = smov 1024   ;;  %s6048_s14 = smov 64  }
  0x3a   : > { %4799 = dma.hbm_to_vmem [thread:$0]  (!%p5299_p8), %s5313_s26, 16384, %s5315_s27, %s5317_s23, %s5161_s16, %s5161_s16, %s6048_s14  }
  0x3b   : > { %s6068_s19 = sshll.u32 %s5158_s24, 14  ;;  %s6069_s10 = sld [smem:[#allocation19_spill]] }
  0x3c   : > { %s6070_s29 = sshll.u32 %s5297_s0, 10  ;;  %p4182_p7 = scmp.ge.s32.totalorder %s5158_s24, 1 }
  0x3d   : > { %s565_s21 = scalar_lea.vmem [#allocation7], %s6070_s29  ;;  %p598_p12 = scmp.lt.s32.totalorder %s5158_s24, 3 }
  0x3e   : > { %s572_s8 = sshll.u32 %s565_s21, 4  ;;  %s4783_s1 = smul.u32 192, %s5297_s0  ;;  %s5357_s8 = int_to_ptr.vmem [resolvable:$true] %s572_s8 }
  0x3f   : > { %p5361_p13 = pnand %p4182_p7, %p598_p12  ;;  %s4784_s26 = smul.u32 3072, %s5158_s24 }
  0x40   : > { %s6072_s2 = sld [smem:[#allocation15_spill]]  ;;  %s480_s29 = scalar_lea.sflag [#allocation4], %s5297_s0 }
  0x41   : > { %s5352_s18 = scalar_lea.hbm %s6069_s10, %s6068_s19  ;;  %s483_s19 = scalar_lea.vmem [#allocation3], %s4783_s1 }
  0x42   : > { %s6071_s13 = scalar_select %p5361_p13, 1, 0 }
  0x43   : > { %s490_s28 = sshll.u32 %s483_s19, 4  ;;  %s5371_s28 = int_to_ptr.vmem [resolvable:$true] %s490_s28 }
  0x46   : > { %s5369_s20 = scalar_lea.hbm %s6072_s2, %s4784_s26  ;;  %s5069_s12 = scalar_lea.hbm %s6072_s2, 6144 }
  0x47   : > { %s5064_s21 = scalar_lea.hbm %s5369_s20, 3072  ;;  %p5070_p3 = scmp.lt.s32.totalorder %s5369_s20, %s6072_s2 }
  0x48   : > { %p5065_p0 = scmp.ne.s32.totalorder %s5369_s20, %s5064_s21  ;;  %p5071_p4 = scmp.lt.s32.totalorder %s5069_s12, %s5064_s21 }
  0x4a   : > { %p5067_p1 = pnand %p5065_p0, %p5323_p10  ;;  %p5072_p5 = por %p5071_p4, %p5070_p3 }
  0x4c   : > { %p5068_p2 = pneg %p5067_p1 }
  0x4e   : > { %p5073_p6 = pnand %p5072_p5, %p5068_p2 }
  0x50   : > { %5076 = shalt.err (!%p5073_p6)
}
  0x51   : > { %s5077_s1 = scalar_lea.vmem %s5371_s28, 3072  ;;  %s5163_s16 = smov [#allocation3]  }
  0x52   : > { %p5078_p9 = scmp.ne.s32.totalorder %s5371_s28, %s5077_s1  ;;  %s5082_s14 = sshll.u32 %s5163_s16, 4  ;;  %s5083_s14 = int_to_ptr.vmem [resolvable:$false] %s5082_s14 }
  0x53   : > { %s5084_s19 = scalar_lea.vmem %s5083_s14, 6144  ;;  %p5085_p12 = scmp.lt.s32.totalorder %s5371_s28, %s5083_s14 }
  0x54   : > { %p5080_p11 = pnand %p5078_p9, %p5323_p10  ;;  %p5086_p0 = scmp.lt.s32.totalorder %s5084_s19, %s5077_s1 }
  0x56   : > { %p5081_p7 = pneg %p5080_p11  ;;  %p5087_p1 = por %p5086_p0, %p5085_p12 }
  0x58   : > { %p5088_p13 = pnand %p5087_p1, %p5081_p7 }
  0x5a   : > { %5091 = shalt.err (!%p5088_p13)
}
  0x5b   : > { %s5164_s12 = smov 192   ;;  %s5165_s21 = smov 12  }
  0x5c   : > { %4796 = dma.hbm_to_vmem [thread:$0]  (!%p5299_p8), %s5369_s20, 3072, %s5371_s28, %s480_s29, %s5164_s12, %s5164_s12, %s5165_s21  }
  0x5d   : > { %s5092_s24 = scalar_lea.hbm %s5352_s18, 16384  ;;  %s5097_s1 = scalar_lea.hbm %s6069_s10, 32768 }
  0x5e   : > { %p5093_p2 = scmp.ne.s32.totalorder %s5352_s18, %s5092_s24  ;;  %p5098_p13 = scmp.lt.s32.totalorder %s5352_s18, %s6069_s10 }
  0x5f   : > { %p5099_p5 = scmp.lt.s32.totalorder %s5097_s1, %s5092_s24 }
  0x60   : > { %p5095_p3 = pnand %p5093_p2, %p5323_p10 }
  0x61   : > { %p5100_p6 = por %p5099_p5, %p5098_p13 }
  0x62   : > { %p5096_p4 = pneg %p5095_p3 }
  0x64   : > { %p5101_p9 = pnand %p5100_p6, %p5096_p4 }
  0x66   : > { %5104 = shalt.err (!%p5101_p9)
}
  0x67   : > { %s5105_s0 = scalar_lea.vmem %s5357_s8, 16384  ;;  %s5166_s20 = smov [#allocation7]  }
  0x68   : > { %p5106_p11 = scmp.ne.s32.totalorder %s5357_s8, %s5105_s0  ;;  %s5110_s28 = sshll.u32 %s5166_s20, 4  ;;  %s5111_s28 = int_to_ptr.vmem [resolvable:$false] %s5110_s28 }
  0x69   : > { %s5112_s29 = scalar_lea.vmem %s5111_s28, 32768  ;;  %p5113_p0 = scmp.lt.s32.totalorder %s5357_s8, %s5111_s28 }
  0x6a   : > { %p5108_p7 = pnand %p5106_p11, %p5323_p10  ;;  %p5114_p1 = scmp.lt.s32.totalorder %s5112_s29, %s5105_s0 }
  0x6c   : > { %p5109_p12 = pneg %p5108_p7  ;;  %p5115_p2 = por %p5114_p1, %p5113_p0 }
  0x6e   : > { %p5116_p3 = pnand %p5115_p2, %p5109_p12 }
  0x70   : > { %5119 = shalt.err (!%p5116_p3)
}
  0x71   : > { %s5167_s19 = smov 4   ;;  %s6073_s12 = smov 64  }
  0x72   : > { %4802 = dma.hbm_to_vmem [thread:$0]  (!%p5299_p8), %s5352_s18, 16384, %s5357_s8, %s5317_s23, %s6073_s12, %s6073_s12, %s5167_s19  }
  0x73   : > { %p6074_p10 = scmp.ne.s32.totalorder %s6071_s13, 0 }
  0x74   : > { %s604_s15 = sand.u32 (!%p6074_p10), 1, %s5150_s22   ;;  %p6075_p4 = scmp.ne.s32.totalorder (!%p6074_p10), %s6064_s30, 0 }
  0x75   : > { %602 = sbr.rel (%p6074_p10) target bundleno = 2258 (0x8d2), region = 84  ;;  %s605_s24 = scalar_lea.sflag (!%p6074_p10), [#allocation4], %s604_s15 }
  0x76   : > { %s4785_s21 = smul.u32 (!%p6074_p10), 192, %s604_s15 }
  0x78   : > { %s5422_s27 = scalar_lea.vmem (!%p6074_p10), [#allocation3], %s4785_s21 }
  0x7a   : > { %5137 = dma.done.wait (%p6075_p4), %s605_s24, 3072  }
  0x7b   : > { %5139 = vsyncadd (%p6075_p4), %s605_s24, 4294964224  ;;  %s613_s17 = sand.u32 1, %s5275_s25   ;;  %s4183_s26 = sshll.u32 %s604_s15, 10 }
  0x7c   : > { %s614_s8 = scalar_lea.sflag [#allocation6], %s613_s17  ;;  %s5429_s23 = scalar_lea.vmem [#allocation5], %s4183_s26 }
  0x7d   : > { %5141 = dma.done.wait (%p6075_p4), %s614_s8, 32768  }
  0x7e   : > { %5143 = vsyncadd (%p6075_p4), %s614_s8, 4294934528  ;;  %p711_p8 = scmp.lt.s32.totalorder %s5275_s25, 1  ;;  %s6076_s4 = sld [smem:[#allocation17_spill]] }
  0x7f   : > { %s6077_s3 = sld [smem:[#allocation16_spill]]  ;;  %s5481_s17 = scalar_lea.vmem [#allocation7], %s4183_s26 }
  0x80   : > { %s5437_s13 = scalar_select %p711_p8, %s5275_s25, 1 }
  0x81   : > { %s6078_s28 = sld [smem:[#allocation20_spill]]  ;;  %p4188_p13 = scmp.ne.s32.totalorder %s5275_s25, 0 }
  0x82   : > { %s4786_s18 = smul.u32 3, %s5437_s13  ;;  %s4490_s1 = sshll.u32 %s5437_s13, 6 }
  0x83   : > { %s728_s2 = scalar_lea.vmem %s6029_s7, %s5437_s13  ;;  %s4187_s16 = sshll.u32 %s5437_s13, 4 }
  0x84   : > { %s5444_s30 = scalar_lea.vmem %s6076_s4, %s4490_s1  ;;  %s5467_s4 = scalar_lea.vmem %s6031_s9, %s4187_s16 }
  0x85   : > { %s5453_s12 = scalar_lea.vmem %s6077_s3, %s4786_s18  ;;  %s735_s29 = scalar_lea.vmem %s6033_s11, %s5437_s13 }
  0x86   : > { %s6079_s24 = sld [smem:[#allocation21_spill]] }
  0x87   : > { %s738_s3 = scalar_lea.vmem %s6078_s28, %s5437_s13  ;;  %s6080_s1 = sld [smem:[#allocation13_spill]] (!%p4188_p13) }
  0x88   : > { %746 = sbr.rel (%p4188_p13) target bundleno = 143 (0x8f), region = 100 }
  0x8c   : > { %s741_s10 = scalar_lea.vmem %s6079_s24, %s5437_s13 }
  0x8d   : > { %v747_v0 = vld [vmem:[%s6080_s1] sm:$0xff]  ;;  %v748_v1 = vld [vmem:[%s6080_s1 + $0x8] sm:$0xff] }
  0x8e   : > { %749 = vst [vmem:[#allocation2] sm:$0xff] %v747_v0  ;;  %750 = vst [vmem:[#allocation2 + $0x8] sm:$0xff] %v748_v1 }
  0x8f PF: > { %v4844_v2 = vld [vmem:[%s5422_s27 + $0xac] ss:$12 sps:$4 sm:$0xff]   ;;  %v4846_v3 = vld [vmem:[%s5422_s27 + $0xa8] ss:$12 sps:$4 sm:$0xff]   ;;  %v5168_v4 = vmov 0   ;;  %v5169_v5 = vmov 0.0   ;;  %v788_v47 = vlaneseq }
  0x90   : > { %963 = vmatprep.mubr.bf16.mxu0 %v5168_v4  ;;  %4705 = vmatprep.subr.bf16.mxu1 %v5169_v5  ;;  %v4847_v6 = vld [vmem:[%s5422_s27 + $0x94] ss:$12 sps:$4 sm:$0xff]   ;;  %v4849_v7 = vld [vmem:[%s5422_s27 + $0x90] ss:$12 sps:$4 sm:$0xff]   ;;  %v4852_v9 = vld [vmem:[%s5422_s27 + $0x78] ss:$12 sps:$4 sm:$0xff]  }
  0x91   : > { %931 = vmatprep.subr.bf16.mxu0 %v4844_v2  ;;  %v4850_v8 = vld [vmem:[%s5422_s27 + $0x7c] ss:$12 sps:$4 sm:$0xff]   ;;  %v4853_v10 = vld [vmem:[%s5422_s27 + $0x64] ss:$12 sps:$4 sm:$0xff]   ;;  %v4855_v11 = vld [vmem:[%s5422_s27 + $0x60] ss:$12 sps:$4 sm:$0xff]  }
  0x92   : > { %932 = vmatpush1.bf16.msra.mxu0 %v4846_v3  ;;  %v4856_v12 = vld [vmem:[%s5422_s27 + $0x4c] ss:$12 sps:$4 sm:$0xff]   ;;  %v4858_v13 = vld [vmem:[%s5422_s27 + $0x48] ss:$12 sps:$4 sm:$0xff]   ;;  %v4868_v14 = vld [vmem:[%s5422_s27 + $0xb0] ss:$12 sps:$4 sm:$0xff]  }
  0x93   : > { %933 = vmatprep.subr.bf16.mxu0 %v4847_v6  ;;  %v4859_v15 = vld [vmem:[%s5422_s27 + $0x34] ss:$12 sps:$4 sm:$0xff]   ;;  %v4861_v16 = vld [vmem:[%s5422_s27 + $0x30] ss:$12 sps:$4 sm:$0xff]   ;;  %4706 = vmatpush3.bf16.msra.mxu1 %v4868_v14  ;;  %v4864_v18 = vld [vmem:[%s5422_s27 + $0x18] ss:$12 sps:$4 sm:$0xff]  }
  0x94   : > { %v4862_v17 = vld [vmem:[%s5422_s27 + $0x1c] ss:$12 sps:$4 sm:$0xff]   ;;  %4707 = vmatprep.subr.bf16.mxu1 %v5169_v5  ;;  %v4865_v19 = vld [vmem:[%s5422_s27 + $0x4] ss:$12 sps:$4 sm:$0xff]   ;;  %v4867_v20 = vld [vmem:[%s5422_s27] ss:$12 sps:$4 sm:$0xff]  }
  0x95   : > { %v5510_v21 = vld [vmem:[#allocation2] sm:$0xff]  ;;  %v5512_v22 = vld [vmem:[#allocation2 + $0x8] sm:$0xff]  ;;  %s6081_s24 = sld [smem:[#allocation14_spill]]  ;;  %v4870_v38 = vld [vmem:[%s5422_s27 + $0x80] ss:$12 sps:$4 sm:$0xff]   ;;  %vm5170_vm0 = vmmov 0  }
  0x96   : > { %934 = vmatpush1.bf16.msra.mxu0 %v4849_v7  ;;  %v5519_v24 = vpack.c.bf16 %v5512_v22, %v5510_v21  ;;  %v4869_v35 = vld [vmem:[%s5422_s27 + $0x98] ss:$12 sps:$4 sm:$0xff]   ;;  %v4871_v41 = vld [vmem:[%s5422_s27 + $0x68] ss:$12 sps:$4 sm:$0xff]   ;;  %v4872_v43 = vld [vmem:[%s5422_s27 + $0x50] ss:$12 sps:$4 sm:$0xff]   ;;  %4721 = vmatprep.mubr.msk.bf16.mxu1 %vm5170_vm0, %v5169_v5 }
  0x97   : > { %935 = vmatprep.subr.bf16.mxu0 %v4850_v8  ;;  %4708 = vmatpush3.bf16.msra.mxu1 %v4869_v35  ;;  %v4873_v44 = vld [vmem:[%s5422_s27 + $0x38] ss:$12 sps:$4 sm:$0xff]   ;;  %v4874_v45 = vld [vmem:[%s5422_s27 + $0x20] ss:$12 sps:$4 sm:$0xff]   ;;  %v4875_v46 = vld [vmem:[%s5422_s27 + $0x8] ss:$12 sps:$4 sm:$0xff]  }
  0x98   : > { %4709 = vmatprep.subr.bf16.mxu1 %v5169_v5  ;;  %v5584_v48 = vshrl.u32 %v788_v47, 7  ;;  %v5593_v51 = vld [vmem:[%s5453_s12] sm:$0x7]  ;;  %v4876_v2 = vld [vmem:[%s5444_s30 + $0x38] sm:$0xff]   ;;  %v4877_v7 = vld [vmem:[%s5444_s30 + $0x30] sm:$0xff]   ;;  %s6083_s12 = scalar_lea.vmem %s6027_s5, %s5437_s13  ;;  %p4483_p5 = scmp.ne.s32.totalorder %s5275_s25, 1 }
  0x99   : > { %v4882_v14 = vld [vmem:[%s5444_s30 + $0x8] sm:$0xff]   ;;  %s6087_s25 = sld [smem:[#allocation22_spill]] (!%p4483_p5) }
  0x9a   : > { %936 = vmatpush1.bf16.msra.mxu0 %v4852_v9  ;;  %v5587_v49 = vsub.s32 0, %v5584_v48  ;;  %v5590_v50 = vsub.s32 1, %v5584_v48  ;;  %v4878_v9 = vld [vmem:[%s5444_s30 + $0x28] sm:$0xff]   ;;  %s6088_s14 = sld [smem:[#allocation23_spill]] (!%p4483_p5) }
  0x9b   : > { %937 = vmatprep.subr.bf16.mxu0 %v4853_v10  ;;  %s6082_s20 = smov %s6081_s24  ;;  %v1034_v23 = vld [vmem:[%s6081_s24 + $0x78] sm:$0xff]  ;;  %4710 = vmatpush3.bf16.msra.mxu1 %v4870_v38  ;;  %s6084_s24 = scalar_lea.vmem %s6028_s6, %s5437_s13 }
  0x9c   : > { %v1033_v25 = vld [vmem:[%s6082_s20 + $0x70] sm:$0xff]  ;;  %v1032_v26 = vld [vmem:[%s6082_s20 + $0x68] sm:$0xff]  ;;  %v1031_v27 = vld [vmem:[%s6082_s20 + $0x60] sm:$0xff]  ;;  %4711 = vmatprep.subr.bf16.mxu1 %v5169_v5  ;;  %v791_v52 = vrot.slane %v5593_v51, %v5587_v49  ;;  %v795_v53 = vrot.slane %v5593_v51, %v5590_v50 }
  0x9d   : > { %v1030_v28 = vld [vmem:[%s6082_s20 + $0x58] sm:$0xff]  ;;  %v1029_v29 = vld [vmem:[%s6082_s20 + $0x50] sm:$0xff]  ;;  %v1028_v30 = vld [vmem:[%s6082_s20 + $0x48] sm:$0xff] }
  0x9e   : > { %938 = vmatpush1.bf16.msra.mxu0 %v4855_v11  ;;  %v1027_v31 = vld [vmem:[%s6082_s20 + $0x40] sm:$0xff]  ;;  %v1026_v32 = vld [vmem:[%s6082_s20 + $0x38] sm:$0xff]  ;;  %v1025_v33 = vld [vmem:[%s6082_s20 + $0x30] sm:$0xff] }
  0x9f   : > { %939 = vmatprep.subr.bf16.mxu0 %v4856_v12  ;;  %v1024_v34 = vld [vmem:[%s6082_s20 + $0x28] sm:$0xff]  ;;  %v1023_v36 = vld [vmem:[%s6082_s20 + $0x20] sm:$0xff]  ;;  %v1022_v37 = vld [vmem:[%s6082_s20 + $0x18] sm:$0xff]  ;;  %4712 = vmatpush3.bf16.msra.mxu1 %v4871_v41 }
  0xa0   : > { %v1021_v39 = vld [vmem:[%s6082_s20 + $0x10] sm:$0xff]  ;;  %v1020_v40 = vld [vmem:[%s6082_s20 + $0x8] sm:$0xff]  ;;  %v1019_v42 = vld [vmem:[%s6082_s20] sm:$0xff]  ;;  %4713 = vmatprep.subr.bf16.mxu1 %v5169_v5 }
  0xa1   : > { %v4879_v11 = vld [vmem:[%s5444_s30 + $0x20] sm:$0xff]   ;;  %v4880_v12 = vld [vmem:[%s5444_s30 + $0x18] sm:$0xff]  }
  0xa2   : > { %940 = vmatpush1.bf16.msra.mxu0 %v4858_v13  ;;  %v4881_v13 = vld [vmem:[%s5444_s30 + $0x10] sm:$0xff]  }
  0xa3   : > { %941 = vmatprep.subr.bf16.mxu0 %v4859_v15  ;;  %4714 = vmatpush3.bf16.msra.mxu1 %v4872_v43  ;;  %v4883_v15 = vld [vmem:[%s5444_s30] sm:$0xff]   ;;  %s6089_s30 = sld [smem:[#allocation24_spill]] (!%p4483_p5) }
  0xa4   : > { %4715 = vmatprep.subr.bf16.mxu1 %v5169_v5 }
  0xa6   : > { %942 = vmatpush1.bf16.msra.mxu0 %v4861_v16 }
  0xa7   : > { %943 = vmatprep.subr.bf16.mxu0 %v4862_v17  ;;  %4716 = vmatpush3.bf16.msra.mxu1 %v4873_v44 }
  0xa8   : > { %4717 = vmatprep.subr.bf16.mxu1 %v5169_v5 }
  0xaa   : > { %944 = vmatpush1.bf16.msra.mxu0 %v4864_v18 }
  0xab   : > { %945 = vmatprep.subr.bf16.mxu0 %v4865_v19  ;;  %4718 = vmatpush3.bf16.msra.mxu1 %v4874_v45 }
  0xac   : > { %4719 = vmatprep.subr.bf16.mxu1 %v5169_v5 }
  0xae   : > { %946 = vmatpush1.bf16.msra.mxu0 %v4867_v20 }
  0xaf   : > { %4725 = vmatprep.subr.mxu0 %v1034_v23  ;;  %4720 = vmatpush3.bf16.msra.mxu1 %v4875_v46 }
  0xb0   : > { %4763 = vmatprep.subr.bf16.mxu1 %v5169_v5 }
  0xb1   : > { %964 = vmatmul.mubr.bf16.vlgmr.msra.gmra.mxu0 %v5519_v24 }
  0xb2   : > { %4726 = vmatpush3.msra.mxu0 %v1034_v23  ;;  %4722 = vmatmul.mubr.bf16.vlgmr.msra.gmra.mxu1 %v5519_v24 }
  0xb3   : > { %4727 = vmatprep.subr.mxu0 %v1033_v25  ;;  %4779 = vmatprep.mubr.msk.bf16.mxu1 %vm5170_vm0, %v5169_v5 }
  0xb4   : > { %4728 = vmatpush3.msra.mxu0 %v1033_v25  ;;  %4764 = vmatpush3.bf16.msra.mxu1 %v4876_v2  ;;  %v1417_v2 = vld [vmem:[%s5429_s23 + $0x388] sm:$0xff] }
  0xb5   : > { %4729 = vmatprep.subr.mxu0 %v1032_v26  ;;  %4765 = vmatprep.subr.bf16.mxu1 %v5169_v5 }
  0xb6   : > { %4730 = vmatpush3.msra.mxu0 %v1032_v26 }
  0xb7   : > { %4731 = vmatprep.subr.mxu0 %v1031_v27 }
  0xb8   : > { %4732 = vmatpush3.msra.mxu0 %v1031_v27  ;;  %4766 = vmatpush3.bf16.msra.mxu1 %v4877_v7  ;;  %v1425_v7 = vld [vmem:[%s5429_s23 + $0x3c8] sm:$0xff] }
  0xb9   : > { %4733 = vmatprep.subr.mxu0 %v1030_v28  ;;  %4767 = vmatprep.subr.bf16.mxu1 %v5169_v5 }
  0xba   : > { %4734 = vmatpush3.msra.mxu0 %v1030_v28 }
  0xbb   : > { %4735 = vmatprep.subr.mxu0 %v1029_v29 }
  0xbc   : > { %4736 = vmatpush3.msra.mxu0 %v1029_v29  ;;  %4768 = vmatpush3.bf16.msra.mxu1 %v4878_v9  ;;  %v4339_v9 = vcombine.high %v1417_v2, %v1425_v7 }
  0xbd   : > { %4737 = vmatprep.subr.mxu0 %v1028_v30  ;;  %4769 = vmatprep.subr.bf16.mxu1 %v5169_v5 }
  0xbe   : > { %4738 = vmatpush3.msra.mxu0 %v1028_v30 }
  0xbf   : > { %4739 = vmatprep.subr.mxu0 %v1027_v31 }
  0xc0   : > { %4740 = vmatpush3.msra.mxu0 %v1027_v31  ;;  %4770 = vmatpush3.bf16.msra.mxu1 %v4879_v11 }
  0xc1   : > { %4741 = vmatprep.subr.mxu0 %v1026_v32  ;;  %4771 = vmatprep.subr.bf16.mxu1 %v5169_v5 }
  0xc2   : > { %4742 = vmatpush3.msra.mxu0 %v1026_v32 }
  0xc3   : > { %4743 = vmatprep.subr.mxu0 %v1025_v33 }
  0xc4   : > { %4744 = vmatpush3.msra.mxu0 %v1025_v33  ;;  %4772 = vmatpush3.bf16.msra.mxu1 %v4880_v12 }
  0xc5   : > { %4745 = vmatprep.subr.mxu0 %v1024_v34  ;;  %4773 = vmatprep.subr.bf16.mxu1 %v5169_v5 }
  0xc6   : > { %4746 = vmatpush3.msra.mxu0 %v1024_v34 }
  0xc7   : > { %4747 = vmatprep.subr.mxu0 %v1023_v36 }
  0xc8   : > { %4748 = vmatpush3.msra.mxu0 %v1023_v36  ;;  %4774 = vmatpush3.bf16.msra.mxu1 %v4881_v13 }
  0xc9   : > { %4749 = vmatprep.subr.mxu0 %v1022_v37  ;;  %4775 = vmatprep.subr.bf16.mxu1 %v5169_v5 }
  0xca   : > { %4750 = vmatpush3.msra.mxu0 %v1022_v37 }
  0xcb   : > { %4751 = vmatprep.subr.mxu0 %v1021_v39 }
  0xcc   : > { %4752 = vmatpush3.msra.mxu0 %v1021_v39  ;;  %4776 = vmatpush3.bf16.msra.mxu1 %v4882_v14 }
  0xcd   : > { %4753 = vmatprep.subr.mxu0 %v1020_v40  ;;  %4777 = vmatprep.subr.bf16.mxu1 %v5169_v5  ;;  %v5616_v5 = vsub.s32 2, %v5584_v48 }
  0xce   : > { %4754 = vmatpush3.msra.mxu0 %v1020_v40 }
  0xcf   : > { %4755 = vmatprep.subr.mxu0 %v1019_v42  ;;  %v799_v32 = vrot.slane %v5593_v51, %v5616_v5 }
  0xd0   : > { %4756 = vmatpush3.msra.mxu0 %v1019_v42  ;;  %4778 = vmatpush3.bf16.msra.mxu1 %v4883_v15 }
  0xd1   : > { %2200 = vmatprep.subr.bf16.mxu1 %v4339_v9  ;;  %v1305_v9 = vld [vmem:[%s5429_s23 + $0x8] sm:$0xff] }
 0x171   : > { %v965_v54 = vpop.f32.mrf.mxu0 }
 0x172   : > { %v966_v56 = vadd.f32 %v965_v54, %v791_v52  ;;  %v1008_v3 = vpop.f32.mrf.mxu1 }
 0x173   : > { %v967_v55 = vpop.f32.mrf.mxu0  ;;  %v1009_v33 = vadd.f32 %v1008_v3, %v799_v32 }
 0x174   : > { %v968_v57 = vadd.f32 %v967_v55, %v795_v53  ;;  %v4723_v6 = vpop.f32.mrf.mxu1 }
 0x175   : > { %v969_v58 = vpop.f32.mrf.mxu0 }
 0x176   : > { %v1015_v59 = vmul.f32 %v968_v57, %v966_v56  ;;  %v970_v60 = vadd.f32 %v969_v58, %v791_v52  ;;  %v1011_v8 = vpop.f32.mrf.mxu1 }
 0x177   : > { %v971_v61 = vpop.f32.mrf.mxu0  ;;  %v1012_v34 = vadd.f32 %v1011_v8, %v799_v32  ;;  %v4338_v8 = vcombine.low %v1417_v2, %v1425_v7  ;;  %v1304_v7 = vld [vmem:[%s5429_s23] sm:$0xff] }
 0x178   : > { %v972_v62 = vadd.f32 %v971_v61, %v795_v53  ;;  %4757 = vmatprep.mubr.f32.mxu0 %v1015_v59  ;;  %v1017_v0 = vmul.f32 %v970_v60, %v968_v57  ;;  %v4724_v10 = vpop.f32.mrf.mxu1 }
 0x17a   : > { %v1016_v63 = vmul.f32 %v972_v62, %v966_v56  ;;  %v1018_v1 = vmul.f32 %v972_v62, %v970_v60  ;;  %v4221_v56 = vld [vmem:[%s6083_s12] ss:$0 sm:$0xff] }
 0x17c   : > { %4758 = vmatmul.mubr.f32.vlgmr.msra.gmra.mxu0 %v1016_v63 }
 0x17d   : > { %4760 = vmatprep.mubr.f32.mxu0 %v1017_v0  ;;  %v1416_v0 = vld [vmem:[%s5429_s23 + $0x380] sm:$0xff] }
 0x180   : > { %4761 = vmatmul.mubr.f32.gmra.mxu0 %v1018_v1  ;;  %v1424_v1 = vld [vmem:[%s5429_s23 + $0x3c0] sm:$0xff] }
 0x181   : > { %2189 = vmatprep.mubr.bf16.mxu0 %v5168_v4  ;;  %v4336_v3 = vcombine.low %v1416_v0, %v1424_v1  ;;  %v4337_v6 = vcombine.high %v1416_v0, %v1424_v1  ;;  %v1329_v1 = vld [vmem:[%s5429_s23 + $0xc8] sm:$0xff] }
 0x183   : > { %2157 = vmatprep.subr.bf16.mxu0 %v4337_v6 }
 0x184   : > { %2158 = vmatpush1.bf16.msra.mxu0 %v4336_v3 }
 0x23c   : > { %v4759_v16 = vpop.f32.mrf.mxu0 }
 0x23e   : > { %v1101_v17 = vpop.f32.mrf.mxu0 }
 0x23f   : > { %v1120_v18 = vmax.f32 %v1101_v17, %v4759_v16 }
 0x240   : > { %v4762_v19 = vpop.f32.mrf.mxu0 }
 0x241   : > { %v1121_v20 = vsub.f32 %v1101_v17, %v1120_v18  ;;  %v1124_v23 = vsub.f32 %v4759_v16, %v1120_v18  ;;  %v1400_v16 = vld [vmem:[%s5429_s23 + $0x300] sm:$0xff]  ;;  %v1401_v18 = vld [vmem:[%s5429_s23 + $0x308] sm:$0xff] }
 0x242   : > { %v1111_v24 = vpop.f32.mrf.mxu0  ;;  %v1408_v17 = vld [vmem:[%s5429_s23 + $0x340] sm:$0xff] }
 0x243   : > { %v1122_v25 = vmul.f32 1.442695, %v1121_v20  ;;  %v1125_v26 = vmul.f32 1.442695, %v1124_v23  ;;  %v1133_v27 = vmax.f32 %v1111_v24, %v4762_v19  ;;  %v1409_v20 = vld [vmem:[%s5429_s23 + $0x348] sm:$0xff]  ;;  %v4320_v23 = vcombine.low %v1400_v16, %v1408_v17 }
 0x245   : > { %5012 = vpow2.f32 %v1122_v25  ;;  %v1134_v28 = vsub.f32 %v1111_v24, %v1133_v27  ;;  %v1137_v29 = vsub.f32 %v4762_v19, %v1133_v27  ;;  %v4321_v19 = vcombine.high %v1400_v16, %v1408_v17  ;;  %v1392_v27 = vld [vmem:[%s5429_s23 + $0x2c0] sm:$0xff]  ;;  %v1426_v16 = vld [vmem:[%s5429_s23 + $0x3d0] sm:$0xff]  ;;  %v1419_v17 = vld [vmem:[%s5429_s23 + $0x398] sm:$0xff] }
 0x246   : > { %5014 = vpow2.f32 %v1125_v26  ;;  %v4322_v24 = vcombine.low %v1401_v18, %v1409_v20  ;;  %v4323_v25 = vcombine.high %v1401_v18, %v1409_v20  ;;  %v1384_v26 = vld [vmem:[%s5429_s23 + $0x280] sm:$0xff] }
 0x247   : > { %v1135_v30 = vmul.f32 1.442695, %v1134_v28  ;;  %v1138_v31 = vmul.f32 1.442695, %v1137_v29  ;;  %2159 = vmatprep.subr.bf16.mxu0 %v4321_v19  ;;  %v1385_v28 = vld [vmem:[%s5429_s23 + $0x288] sm:$0xff]  ;;  %v4305_v29 = vcombine.high %v1384_v26, %v1392_v27  ;;  %v1427_v19 = vld [vmem:[%s5429_s23 + $0x3d8] sm:$0xff] }
 0x248   : > { %2160 = vmatpush1.bf16.msra.mxu0 %v4320_v23  ;;  %v4342_v23 = vcombine.low %v1419_v17, %v1427_v19 }
 0x249   : > { %5016 = vpow2.f32 %v1135_v30  ;;  %v1393_v30 = vld [vmem:[%s5429_s23 + $0x2c8] sm:$0xff]  ;;  %2161 = vmatprep.subr.bf16.mxu0 %v4305_v29 }
 0x24a   : > { %5018 = vpow2.f32 %v1138_v31  ;;  %v4304_v31 = vcombine.low %v1384_v26, %v1392_v27  ;;  %v4306_v32 = vcombine.low %v1385_v28, %v1393_v30 }
 0x24c   : > { %2162 = vmatpush1.bf16.msra.mxu0 %v4304_v31 }
 0x252   : > { %v5013_v35 = vpop.eup %5012 }
 0x253   : > { %v5015_v36 = vpop.eup %5014  ;;  %v1127_v37 = vmul.f32 %v5013_v35, %v1009_v33 }
 0x254   : > { %v1128_v38 = vadd.f32 %v5015_v36, %v5013_v35  ;;  %v1129_v39 = vmul.f32 %v5015_v36, %v1012_v34  ;;  %v1376_v35 = vld [vmem:[%s5429_s23 + $0x240] sm:$0xff]  ;;  %v1369_v36 = vld [vmem:[%s5429_s23 + $0x208] sm:$0xff] }
 0x256   : > { %v5017_v40 = vpop.eup %5016  ;;  %v1130_v41 = vadd.f32 %v1129_v39, %v1127_v37  ;;  %5020 = vrcp.f32 %v1128_v38  ;;  %v1377_v38 = vld [vmem:[%s5429_s23 + $0x248] sm:$0xff] }
 0x257   : > { %v5019_v42 = vpop.eup %5018  ;;  %v1140_v43 = vmul.f32 %v5017_v40, %v1009_v33  ;;  %v4307_v33 = vcombine.high %v1385_v28, %v1393_v30 }
 0x258   : > { %v1141_v44 = vadd.f32 %v5019_v42, %v5017_v40  ;;  %v1142_v45 = vmul.f32 %v5019_v42, %v1012_v34  ;;  %v1368_v34 = vld [vmem:[%s5429_s23 + $0x200] sm:$0xff]  ;;  %v4290_v40 = vcombine.low %v1369_v36, %v1377_v38 }
 0x259   : > { %v4289_v37 = vcombine.high %v1368_v34, %v1376_v35  ;;  %v4288_v39 = vcombine.low %v1368_v34, %v1376_v35  ;;  %v1352_v42 = vld [vmem:[%s5429_s23 + $0x180] sm:$0xff] }
 0x25a   : > { %5022 = vrcp.f32 %v1141_v44  ;;  %v1143_v46 = vadd.f32 %v1142_v45, %v1140_v43  ;;  %v1360_v43 = vld [vmem:[%s5429_s23 + $0x1c0] sm:$0xff]  ;;  %v1353_v44 = vld [vmem:[%s5429_s23 + $0x188] sm:$0xff] }
 0x25b   : > { %2163 = vmatprep.subr.bf16.mxu0 %v4289_v37  ;;  %v4273_v45 = vcombine.high %v1352_v42, %v1360_v43  ;;  %v4223_v37 = vld [vmem:[%s728_s2] ss:$0 sm:$0xff] }
 0x25c   : > { %2164 = vmatpush1.bf16.msra.mxu0 %v4288_v39  ;;  %v1410_v39 = vld [vmem:[%s5429_s23 + $0x350] sm:$0xff] }
 0x25d   : > { %2165 = vmatprep.subr.bf16.mxu0 %v4273_v45 }
 0x263   : > { %v5021_v47 = vpop.eup %5020 }
 0x264   : > { %v1132_v51 = vmul.f32 %v5021_v47, %v1130_v41  ;;  %v4291_v41 = vcombine.high %v1369_v36, %v1377_v38  ;;  %v4272_v47 = vcombine.low %v1352_v42, %v1360_v43 }
 0x266   : > { %2166 = vmatpush1.bf16.msra.mxu0 %v4272_v47  ;;  %v1394_v47 = vld [vmem:[%s5429_s23 + $0x2d0] sm:$0xff] }
 0x267   : > { %v5023_v52 = vpop.eup %5022 }
 0x268   : > { %v1145_v53 = vmul.f32 %v5023_v52, %v1143_v46  ;;  %v1361_v46 = vld [vmem:[%s5429_s23 + $0x1c8] sm:$0xff] }
 0x269   : > { %v4274_v52 = vcombine.low %v1353_v44, %v1361_v46 }
 0x26a   : > { %v1162_v54 = vpack.c.bf16 %v1145_v53, %v1132_v51  ;;  %v4275_v51 = vcombine.high %v1353_v44, %v1361_v46  ;;  %v1336_v53 = vld [vmem:[%s5429_s23 + $0x100] sm:$0xff]  ;;  %v1386_v46 = vld [vmem:[%s5429_s23 + $0x290] sm:$0xff] }
 0x26c   : > { %4780 = vmatmul.mubr.bf16.vlgmr.msra.gmra.mxu1 %v1162_v54  ;;  %v1344_v54 = vld [vmem:[%s5429_s23 + $0x140] sm:$0xff] }
 0x26d   : > { %2232 = vmatprep.mubr.bf16.mxu1 %v5168_v4  ;;  %2201 = vmatpush1.bf16.msra.mxu1 %v4338_v8  ;;  %v1312_v8 = vld [vmem:[%s5429_s23 + $0x40] sm:$0xff] }
 0x26e   : > { %2202 = vmatprep.subr.bf16.mxu1 %v4323_v25 }
 0x271   : > { %2203 = vmatpush1.bf16.msra.mxu1 %v4322_v24  ;;  %v4343_v24 = vcombine.high %v1419_v17, %v1427_v19  ;;  %v1322_v19 = vld [vmem:[%s5429_s23 + $0x90] sm:$0xff] }
 0x272   : > { %2204 = vmatprep.subr.bf16.mxu1 %v4307_v33  ;;  %v4222_v33 = vld [vmem:[%s6084_s24] ss:$0 sm:$0xff] }
 0x275   : > { %2205 = vmatpush1.bf16.msra.mxu1 %v4306_v32 }
 0x276   : > { %2206 = vmatprep.subr.bf16.mxu1 %v4291_v41  ;;  %v1411_v41 = vld [vmem:[%s5429_s23 + $0x358] sm:$0xff] }
 0x279   : > { %2207 = vmatpush1.bf16.msra.mxu1 %v4290_v40  ;;  %v1403_v40 = vld [vmem:[%s5429_s23 + $0x318] sm:$0xff] }
 0x27a   : > { %2208 = vmatprep.subr.bf16.mxu1 %v4275_v51  ;;  %v1395_v51 = vld [vmem:[%s5429_s23 + $0x2d8] sm:$0xff] }
 0x27d   : > { %2209 = vmatpush1.bf16.msra.mxu1 %v4274_v52  ;;  %v1387_v52 = vld [vmem:[%s5429_s23 + $0x298] sm:$0xff] }
 0x32c   : > { %v1245_v55 = vpop.f32.mrf.mxu1 }
 0x32d   : > { %v1252_v57 = vadd.f32 %v1245_v55, %v5510_v21  ;;  %v1337_v55 = vld [vmem:[%s5429_s23 + $0x108] sm:$0xff] }
 0x32e   : > { %v4781_v58 = vpop.f32.mrf.mxu1 }
 0x32f   : > { %v1261_v59 = vadd.f32 %v4221_v56, %v1252_v57  ;;  %v1345_v57 = vld [vmem:[%s5429_s23 + $0x148] sm:$0xff]  ;;  %v4256_v58 = vcombine.low %v1336_v53, %v1344_v54 }
 0x330   : > { %v1248_v60 = vpop.f32.mrf.mxu1 }
 0x331   : > { %v1253_v61 = vadd.f32 %v1248_v60, %v5512_v22  ;;  %1265 = vadd.xlane.f32.xlu0 %v1261_v59  ;;  %v4259_v60 = vcombine.high %v1337_v55, %v1345_v57 }
 0x332   : > { %v4782_v62 = vpop.f32.mrf.mxu1 }
 0x333   : > { %v1262_v63 = vadd.f32 %v4221_v56, %v1253_v61  ;;  %v4257_v56 = vcombine.high %v1336_v53, %v1344_v54  ;;  %2210 = vmatprep.subr.bf16.mxu1 %v4259_v60  ;;  %v1320_v61 = vld [vmem:[%s5429_s23 + $0x80] sm:$0xff]  ;;  %v4326_v54 = vcombine.low %v1403_v40, %v1411_v41  ;;  %v1379_v60 = vld [vmem:[%s5429_s23 + $0x258] sm:$0xff] }
 0x334   : > { %v1328_v62 = vld [vmem:[%s5429_s23 + $0xc0] sm:$0xff] }
 0x335   : > { %1267 = vadd.xlane.f32.xlu0 %v1262_v63  ;;  %2167 = vmatprep.subr.bf16.mxu0 %v4257_v56  ;;  %v4241_v0 = vcombine.high %v1320_v61, %v1328_v62  ;;  %v4240_v2 = vcombine.low %v1320_v61, %v1328_v62  ;;  %v4311_v56 = vcombine.high %v1387_v52, %v1395_v51 }
 0x336   : > { %2168 = vmatpush1.bf16.msra.mxu0 %v4256_v58  ;;  %v1378_v58 = vld [vmem:[%s5429_s23 + $0x250] sm:$0xff]  ;;  %v4308_v61 = vcombine.low %v1386_v46, %v1394_v47  ;;  %v4310_v62 = vcombine.low %v1387_v52, %v1395_v51  ;;  %v1405_v52 = vld [vmem:[%s5429_s23 + $0x328] sm:$0xff] }
 0x337   : > { %2169 = vmatprep.subr.bf16.mxu0 %v4241_v0  ;;  %v1413_v51 = vld [vmem:[%s5429_s23 + $0x368] sm:$0xff] }
 0x33a   : > { %2170 = vmatpush1.bf16.msra.mxu0 %v4240_v2  ;;  %v1362_v2 = vld [vmem:[%s5429_s23 + $0x1d0] sm:$0xff] }
 0x3ba   : > { %v1266_v21 = vpop.xlane.xlu0 %1265 }
 0x3bb   : > { %v1270_v22 = vmul.f32 0.0078125, %v1266_v21  ;;  %v4225_v21 = vcombine.high %v1304_v7, %v1312_v8 }
 0x3bd   : > { %v5632_v10 = vsub.f32 %v1261_v59, %v1270_v22  ;;  %v4258_v59 = vcombine.low %v1337_v55, %v1345_v57  ;;  %v1313_v22 = vld [vmem:[%s5429_s23 + $0x48] sm:$0xff]  ;;  %2171 = vmatprep.subr.bf16.mxu0 %v4225_v21  ;;  %v4309_v55 = vcombine.high %v1386_v46, %v1394_v47  ;;  %v1370_v57 = vld [vmem:[%s5429_s23 + $0x210] sm:$0xff]  ;;  %v1404_v46 = vld [vmem:[%s5429_s23 + $0x320] sm:$0xff] }
 0x3be   : > { %v1268_v11 = vpop.xlane.xlu0 %1267  ;;  %v1412_v47 = vld [vmem:[%s5429_s23 + $0x360] sm:$0xff] }
 0x3bf   : > { %v1271_v12 = vmul.f32 0.0078125, %v1268_v11  ;;  %v1274_v13 = vmul.f32 %v5632_v10, %v5632_v10  ;;  %2211 = vmatpush1.bf16.msra.mxu1 %v4258_v59  ;;  %v4224_v11 = vcombine.low %v1304_v7, %v1312_v8  ;;  %v1371_v59 = vld [vmem:[%s5429_s23 + $0x218] sm:$0xff]  ;;  %v4292_v7 = vcombine.low %v1370_v57, %v1378_v58 }
 0x3c0   : > { %v4295_v0 = vcombine.high %v1371_v59, %v1379_v60  ;;  %v4294_v8 = vcombine.low %v1371_v59, %v1379_v60  ;;  %v1389_v59 = vld [vmem:[%s5429_s23 + $0x2a8] sm:$0xff] }
 0x3c1   : > { %v5636_v14 = vsub.f32 %v1262_v63, %v1271_v12  ;;  %1276 = vadd.xlane.f32.xlu1 %v1274_v13  ;;  %v1321_v63 = vld [vmem:[%s5429_s23 + $0x88] sm:$0xff]  ;;  %v4226_v12 = vcombine.low %v1305_v9, %v1313_v22  ;;  %v4227_v13 = vcombine.high %v1305_v9, %v1313_v22  ;;  %2172 = vmatpush1.bf16.msra.mxu0 %v4224_v11  ;;  %v1338_v22 = vld [vmem:[%s5429_s23 + $0x110] sm:$0xff] }
 0x3c2   : > { %v4242_v3 = vcombine.low %v1321_v63, %v1329_v1  ;;  %v4243_v6 = vcombine.high %v1321_v63, %v1329_v1  ;;  %v4293_v63 = vcombine.high %v1370_v57, %v1378_v58  ;;  %v1354_v1 = vld [vmem:[%s5429_s23 + $0x190] sm:$0xff]  ;;  %v1388_v57 = vld [vmem:[%s5429_s23 + $0x2a0] sm:$0xff]  ;;  %v1397_v60 = vld [vmem:[%s5429_s23 + $0x2e8] sm:$0xff] }
 0x3c3   : > { %v1275_v15 = vmul.f32 %v5636_v14, %v5636_v14  ;;  %v4277_v9 = vcombine.high %v1354_v1, %v1362_v2  ;;  %v1346_v11 = vld [vmem:[%s5429_s23 + $0x150] sm:$0xff]  ;;  %v1396_v58 = vld [vmem:[%s5429_s23 + $0x2e0] sm:$0xff] }
 0x3c4   : > { %2212 = vmatprep.subr.bf16.mxu1 %v4243_v6  ;;  %v1363_v6 = vld [vmem:[%s5429_s23 + $0x1d8] sm:$0xff]  ;;  %v4261_v17 = vcombine.high %v1338_v22, %v1346_v11 }
 0x3c5   : > { %1278 = vadd.xlane.f32.xlu1 %v1275_v15  ;;  %2213 = vmatpush1.bf16.msra.mxu1 %v4242_v3  ;;  %v1418_v15 = vld [vmem:[%s5429_s23 + $0x390] sm:$0xff]  ;;  %v1355_v3 = vld [vmem:[%s5429_s23 + $0x198] sm:$0xff] }
 0x3c6   : > { %2214 = vmatprep.subr.bf16.mxu1 %v4227_v13  ;;  %v4341_v18 = vcombine.high %v1418_v15, %v1426_v16  ;;  %v4340_v20 = vcombine.low %v1418_v15, %v1426_v16  ;;  %v4279_v21 = vcombine.high %v1355_v3, %v1363_v6  ;;  %v1347_v13 = vld [vmem:[%s5429_s23 + $0x158] sm:$0xff]  ;;  %v4276_v15 = vcombine.low %v1354_v1, %v1362_v2  ;;  %v1372_v1 = vld [vmem:[%s5429_s23 + $0x220] sm:$0xff] }
 0x3c7   : > { %v4278_v16 = vcombine.low %v1355_v3, %v1363_v6  ;;  %v1380_v2 = vld [vmem:[%s5429_s23 + $0x260] sm:$0xff]  ;;  %v1373_v3 = vld [vmem:[%s5429_s23 + $0x228] sm:$0xff] }
 0x3c8   : > { %2243 = vmatprep.subr.bf16.mxu0 %v4341_v18  ;;  %v1381_v6 = vld [vmem:[%s5429_s23 + $0x268] sm:$0xff] }
 0x3c9   : > { %2215 = vmatpush1.bf16.msra.mxu1 %v4226_v12  ;;  %v1339_v12 = vld [vmem:[%s5429_s23 + $0x118] sm:$0xff] }
 0x3ca   : > { %2286 = vmatprep.subr.bf16.mxu1 %v4343_v24  ;;  %v4263_v18 = vcombine.high %v1339_v12, %v1347_v13  ;;  %v1331_v24 = vld [vmem:[%s5429_s23 + $0xd8] sm:$0xff] }
 0x44a   : > { %v1277_v25 = vpop.xlane.xlu1 %1276 }
 0x44b   : > { %v1280_v26 = vmul.f32 0.0078125, %v1277_v25  ;;  %v4260_v25 = vcombine.low %v1338_v22, %v1346_v11  ;;  %v1356_v22 = vld [vmem:[%s5429_s23 + $0x1a0] sm:$0xff] }
 0x44c   : > { %v1364_v11 = vld [vmem:[%s5429_s23 + $0x1e0] sm:$0xff] }
 0x44d   : > { %v1282_v27 = vadd.f32 1e-05, %v1280_v26  ;;  %v4262_v26 = vcombine.low %v1339_v12, %v1347_v13  ;;  %v1357_v12 = vld [vmem:[%s5429_s23 + $0x1a8] sm:$0xff] }
 0x44e   : > { %v1279_v28 = vpop.xlane.xlu1 %1278  ;;  %v1365_v13 = vld [vmem:[%s5429_s23 + $0x1e8] sm:$0xff] }
 0x44f   : > { %5024 = vrsqrt.f32 %v1282_v27  ;;  %v1281_v29 = vmul.f32 0.0078125, %v1279_v28 }
 0x451   : > { %v1283_v30 = vadd.f32 1e-05, %v1281_v29  ;;  %v1306_v29 = vld [vmem:[%s5429_s23 + $0x10] sm:$0xff] }
 0x453   : > { %5026 = vrsqrt.f32 %v1283_v30  ;;  %v1314_v30 = vld [vmem:[%s5429_s23 + $0x50] sm:$0xff] }
 0x45c   : > { %v5025_v31 = vpop.eup %5024 }
 0x45d   : > { %v1286_v32 = vmul.f32 %v5025_v31, %v5632_v10  ;;  %v1402_v10 = vld [vmem:[%s5429_s23 + $0x310] sm:$0xff]  ;;  %v1307_v31 = vld [vmem:[%s5429_s23 + $0x18] sm:$0xff] }
 0x45e   : > { %v4325_v45 = vcombine.high %v1402_v10, %v1410_v39  ;;  %v4324_v53 = vcombine.low %v1402_v10, %v1410_v39  ;;  %v1421_v10 = vld [vmem:[%s5429_s23 + $0x3a8] sm:$0xff] }
 0x45f   : > { %v1294_v35 = vmul.f32 %v4222_v33, %v1286_v32  ;;  %v1315_v32 = vld [vmem:[%s5429_s23 + $0x58] sm:$0xff]  ;;  %v1429_v39 = vld [vmem:[%s5429_s23 + $0x3e8] sm:$0xff] }
 0x460   : > { %v5027_v34 = vpop.eup %5026 }
 0x461   : > { %v1287_v36 = vmul.f32 %v5027_v34, %v5636_v14  ;;  %v5688_v42 = vadd.f32 %v4223_v37, %v1294_v35  ;;  %v4327_v14 = vcombine.high %v1403_v40, %v1411_v41  ;;  %v4229_v35 = vcombine.high %v1306_v29, %v1314_v30 }
 0x462   : > { %v4228_v40 = vcombine.low %v1306_v29, %v1314_v30  ;;  %v4230_v41 = vcombine.low %v1307_v31, %v1315_v32  ;;  %v1324_v29 = vld [vmem:[%s5429_s23 + $0xa0] sm:$0xff] }
 0x463   : > { %v1295_v38 = vmul.f32 %v4222_v33, %v1287_v36  ;;  %v4231_v36 = vcombine.high %v1307_v31, %v1315_v32  ;;  %v1332_v30 = vld [vmem:[%s5429_s23 + $0xe0] sm:$0xff]  ;;  %v1325_v31 = vld [vmem:[%s5429_s23 + $0xa8] sm:$0xff] }
 0x464   : > { %v1333_v32 = vld [vmem:[%s5429_s23 + $0xe8] sm:$0xff] }
 0x465   : > { %v5690_v43 = vadd.f32 %v4223_v37, %v1295_v38  ;;  %v1420_v37 = vld [vmem:[%s5429_s23 + $0x3a0] sm:$0xff] }
 0x466   : > { %v1428_v38 = vld [vmem:[%s5429_s23 + $0x3e0] sm:$0xff] }
 0x467   : > { %v5694_v44 = vpack.c.bf16 %v5690_v43, %v5688_v42 }
 0x469   : > { %2190 = vmatmul.mubr.bf16.vlgmr.msra.gmra.mxu0 %v5694_v44  ;;  %2233 = vmatmul.mubr.bf16.vlgmr.msra.gmra.mxu1 %v5694_v44 }
 0x46a   : > { %2244 = vmatpush1.bf16.msra.mxu0 %v4340_v20  ;;  %2287 = vmatpush1.bf16.msra.mxu1 %v4342_v23  ;;  %v1330_v20 = vld [vmem:[%s5429_s23 + $0xd0] sm:$0xff]  ;;  %v1323_v23 = vld [vmem:[%s5429_s23 + $0x98] sm:$0xff] }
 0x46b   : > { %2245 = vmatprep.subr.bf16.mxu0 %v4325_v45  ;;  %2288 = vmatprep.subr.bf16.mxu1 %v4327_v14  ;;  %v4245_v27 = vcombine.high %v1322_v19, %v1330_v20  ;;  %v4247_v28 = vcombine.high %v1323_v23, %v1331_v24  ;;  %v4244_v33 = vcombine.low %v1322_v19, %v1330_v20  ;;  %v1340_v19 = vld [vmem:[%s5429_s23 + $0x120] sm:$0xff] }
 0x46c   : > { %2275 = vmatprep.mubr.bf16.mxu0 %v5168_v4  ;;  %2318 = vmatprep.mubr.bf16.mxu1 %v5168_v4  ;;  %v4246_v34 = vcombine.low %v1323_v23, %v1331_v24  ;;  %v4345_v45 = vcombine.high %v1420_v37, %v1428_v38  ;;  %v4347_v14 = vcombine.high %v1421_v10, %v1429_v39  ;;  %v1348_v20 = vld [vmem:[%s5429_s23 + $0x160] sm:$0xff]  ;;  %v1341_v23 = vld [vmem:[%s5429_s23 + $0x128] sm:$0xff] }
 0x46d   : > { %v1349_v24 = vld [vmem:[%s5429_s23 + $0x168] sm:$0xff] }
 0x46e   : > { %2246 = vmatpush1.bf16.msra.mxu0 %v4324_v53  ;;  %2289 = vmatpush1.bf16.msra.mxu1 %v4326_v54  ;;  %v4344_v53 = vcombine.low %v1420_v37, %v1428_v38  ;;  %v4346_v54 = vcombine.low %v1421_v10, %v1429_v39  ;;  %v1308_v37 = vld [vmem:[%s5429_s23 + $0x20] sm:$0xff]  ;;  %v1309_v10 = vld [vmem:[%s5429_s23 + $0x28] sm:$0xff] }
 0x46f   : > { %2247 = vmatprep.subr.bf16.mxu0 %v4309_v55  ;;  %2290 = vmatprep.subr.bf16.mxu1 %v4311_v56  ;;  %v4329_v55 = vcombine.high %v1404_v46, %v1412_v47  ;;  %v4331_v56 = vcombine.high %v1405_v52, %v1413_v51  ;;  %v1316_v38 = vld [vmem:[%s5429_s23 + $0x60] sm:$0xff]  ;;  %v1317_v39 = vld [vmem:[%s5429_s23 + $0x68] sm:$0xff] }
 0x472   : > { %2248 = vmatpush1.bf16.msra.mxu0 %v4308_v61  ;;  %2291 = vmatpush1.bf16.msra.mxu1 %v4310_v62  ;;  %v4328_v61 = vcombine.low %v1404_v46, %v1412_v47  ;;  %v4330_v62 = vcombine.low %v1405_v52, %v1413_v51  ;;  %v1422_v46 = vld [vmem:[%s5429_s23 + $0x3b0] sm:$0xff]  ;;  %v1423_v52 = vld [vmem:[%s5429_s23 + $0x3b8] sm:$0xff] }
 0x473   : > { %2249 = vmatprep.subr.bf16.mxu0 %v4293_v63  ;;  %2292 = vmatprep.subr.bf16.mxu1 %v4295_v0  ;;  %v4313_v63 = vcombine.high %v1388_v57, %v1396_v58  ;;  %v4315_v0 = vcombine.high %v1389_v59, %v1397_v60  ;;  %v1430_v47 = vld [vmem:[%s5429_s23 + $0x3f0] sm:$0xff]  ;;  %v1431_v51 = vld [vmem:[%s5429_s23 + $0x3f8] sm:$0xff] }
 0x476   : > { %2250 = vmatpush1.bf16.msra.mxu0 %v4292_v7  ;;  %2293 = vmatpush1.bf16.msra.mxu1 %v4294_v8  ;;  %v4312_v7 = vcombine.low %v1388_v57, %v1396_v58  ;;  %v4314_v8 = vcombine.low %v1389_v59, %v1397_v60  ;;  %v1406_v57 = vld [vmem:[%s5429_s23 + $0x330] sm:$0xff]  ;;  %v1407_v59 = vld [vmem:[%s5429_s23 + $0x338] sm:$0xff] }
 0x477   : > { %2251 = vmatprep.subr.bf16.mxu0 %v4277_v9  ;;  %2294 = vmatprep.subr.bf16.mxu1 %v4279_v21  ;;  %v4297_v9 = vcombine.high %v1372_v1, %v1380_v2  ;;  %v4299_v21 = vcombine.high %v1373_v3, %v1381_v6  ;;  %v1414_v58 = vld [vmem:[%s5429_s23 + $0x370] sm:$0xff]  ;;  %v1415_v60 = vld [vmem:[%s5429_s23 + $0x378] sm:$0xff] }
 0x47a   : > { %2252 = vmatpush1.bf16.msra.mxu0 %v4276_v15  ;;  %2295 = vmatpush1.bf16.msra.mxu1 %v4278_v16  ;;  %v4296_v15 = vcombine.low %v1372_v1, %v1380_v2  ;;  %v4298_v16 = vcombine.low %v1373_v3, %v1381_v6  ;;  %v1390_v1 = vld [vmem:[%s5429_s23 + $0x2b0] sm:$0xff]  ;;  %v1391_v3 = vld [vmem:[%s5429_s23 + $0x2b8] sm:$0xff] }
 0x47b   : > { %2253 = vmatprep.subr.bf16.mxu0 %v4261_v17  ;;  %2296 = vmatprep.subr.bf16.mxu1 %v4263_v18  ;;  %v4281_v17 = vcombine.high %v1356_v22, %v1364_v11  ;;  %v4283_v18 = vcombine.high %v1357_v12, %v1365_v13  ;;  %v1398_v2 = vld [vmem:[%s5429_s23 + $0x2f0] sm:$0xff]  ;;  %v1399_v6 = vld [vmem:[%s5429_s23 + $0x2f8] sm:$0xff] }
 0x47e   : > { %2254 = vmatpush1.bf16.msra.mxu0 %v4260_v25  ;;  %2297 = vmatpush1.bf16.msra.mxu1 %v4262_v26  ;;  %v4280_v25 = vcombine.low %v1356_v22, %v1364_v11  ;;  %v4282_v26 = vcombine.low %v1357_v12, %v1365_v13  ;;  %v1374_v22 = vld [vmem:[%s5429_s23 + $0x230] sm:$0xff]  ;;  %v1375_v12 = vld [vmem:[%s5429_s23 + $0x238] sm:$0xff] }
 0x47f   : > { %2255 = vmatprep.subr.bf16.mxu0 %v4245_v27  ;;  %2298 = vmatprep.subr.bf16.mxu1 %v4247_v28  ;;  %v4265_v27 = vcombine.high %v1340_v19, %v1348_v20  ;;  %v4267_v28 = vcombine.high %v1341_v23, %v1349_v24  ;;  %v1382_v11 = vld [vmem:[%s5429_s23 + $0x270] sm:$0xff]  ;;  %v1383_v13 = vld [vmem:[%s5429_s23 + $0x278] sm:$0xff] }
 0x482   : > { %2256 = vmatpush1.bf16.msra.mxu0 %v4244_v33  ;;  %2299 = vmatpush1.bf16.msra.mxu1 %v4246_v34  ;;  %v4264_v33 = vcombine.low %v1340_v19, %v1348_v20  ;;  %v4266_v34 = vcombine.low %v1341_v23, %v1349_v24  ;;  %v1358_v19 = vld [vmem:[%s5429_s23 + $0x1b0] sm:$0xff]  ;;  %v1359_v23 = vld [vmem:[%s5429_s23 + $0x1b8] sm:$0xff] }
 0x483   : > { %2257 = vmatprep.subr.bf16.mxu0 %v4229_v35  ;;  %2300 = vmatprep.subr.bf16.mxu1 %v4231_v36  ;;  %v4249_v35 = vcombine.high %v1324_v29, %v1332_v30  ;;  %v4251_v36 = vcombine.high %v1325_v31, %v1333_v32  ;;  %v1366_v20 = vld [vmem:[%s5429_s23 + $0x1f0] sm:$0xff]  ;;  %v1367_v24 = vld [vmem:[%s5429_s23 + $0x1f8] sm:$0xff] }
 0x486   : > { %2258 = vmatpush1.bf16.msra.mxu0 %v4228_v40  ;;  %2301 = vmatpush1.bf16.msra.mxu1 %v4230_v41  ;;  %v4248_v40 = vcombine.low %v1324_v29, %v1332_v30  ;;  %v4250_v41 = vcombine.low %v1325_v31, %v1333_v32  ;;  %v1350_v29 = vld [vmem:[%s5429_s23 + $0x170] sm:$0xff]  ;;  %v1343_v30 = vld [vmem:[%s5429_s23 + $0x138] sm:$0xff]  ;;  %v4284_v32 = vcombine.low %v1358_v19, %v1366_v20 }
 0x487   : > { %2329 = vmatprep.subr.bf16.mxu0 %v4345_v45  ;;  %2372 = vmatprep.subr.bf16.mxu1 %v4347_v14  ;;  %v4233_v45 = vcombine.high %v1308_v37, %v1316_v38  ;;  %v4235_v14 = vcombine.high %v1309_v10, %v1317_v39  ;;  %v1351_v31 = vld [vmem:[%s5429_s23 + $0x178] sm:$0xff] }
 0x489   : > { %2276 = vmatmul.mubr.bf16.vlgmr.msra.gmra.mxu0 %v5694_v44  ;;  %2319 = vmatmul.mubr.bf16.vlgmr.msra.gmra.mxu1 %v5694_v44 }
 0x48a   : > { %2330 = vmatpush1.bf16.msra.mxu0 %v4344_v53  ;;  %2373 = vmatpush1.bf16.msra.mxu1 %v4346_v54  ;;  %v4232_v53 = vcombine.low %v1308_v37, %v1316_v38  ;;  %v4234_v54 = vcombine.low %v1309_v10, %v1317_v39  ;;  %v1334_v37 = vld [vmem:[%s5429_s23 + $0xf0] sm:$0xff]  ;;  %v1327_v38 = vld [vmem:[%s5429_s23 + $0xb8] sm:$0xff] }
 0x48b   : > { %2331 = vmatprep.subr.bf16.mxu0 %v4329_v55  ;;  %2374 = vmatprep.subr.bf16.mxu1 %v4331_v56  ;;  %v4349_v55 = vcombine.high %v1422_v46, %v1430_v47  ;;  %v4351_v56 = vcombine.high %v1423_v52, %v1431_v51  ;;  %v1335_v10 = vld [vmem:[%s5429_s23 + $0xf8] sm:$0xff] }
 0x48c   : > { %2361 = vmatprep.mubr.bf16.mxu0 %v5168_v4  ;;  %2404 = vmatprep.mubr.bf16.mxu1 %v5168_v4 }
 0x48e   : > { %2332 = vmatpush1.bf16.msra.mxu0 %v4328_v61  ;;  %2375 = vmatpush1.bf16.msra.mxu1 %v4330_v62  ;;  %v4348_v61 = vcombine.low %v1422_v46, %v1430_v47  ;;  %v4350_v62 = vcombine.low %v1423_v52, %v1431_v51  ;;  %v1318_v46 = vld [vmem:[%s5429_s23 + $0x70] sm:$0xff]  ;;  %v1311_v47 = vld [vmem:[%s5429_s23 + $0x38] sm:$0xff] }
 0x48f   : > { %2333 = vmatprep.subr.bf16.mxu0 %v4313_v63  ;;  %2376 = vmatprep.subr.bf16.mxu1 %v4315_v0  ;;  %v4333_v63 = vcombine.high %v1406_v57, %v1414_v58  ;;  %v4335_v0 = vcombine.high %v1407_v59, %v1415_v60  ;;  %v1319_v52 = vld [vmem:[%s5429_s23 + $0x78] sm:$0xff] }
 0x492   : > { %2334 = vmatpush1.bf16.msra.mxu0 %v4312_v7  ;;  %2377 = vmatpush1.bf16.msra.mxu1 %v4314_v8  ;;  %v4332_v7 = vcombine.low %v1406_v57, %v1414_v58  ;;  %v4334_v8 = vcombine.low %v1407_v59, %v1415_v60  ;;  %v4238_v57 = vcombine.low %v1311_v47, %v1319_v52  ;;  %v4884_v58 = vld [vmem:[%s5481_s17 + $0x78] sm:$0xff]  }
 0x493   : > { %2335 = vmatprep.subr.bf16.mxu0 %v4297_v9  ;;  %2378 = vmatprep.subr.bf16.mxu1 %v4299_v21  ;;  %v4317_v9 = vcombine.high %v1390_v1, %v1398_v2  ;;  %v4319_v21 = vcombine.high %v1391_v3, %v1399_v6  ;;  %v4885_v59 = vld [vmem:[%s5481_s17 + $0xf8] sm:$0xff]  }
 0x494   : > { %v4886_v60 = vld [vmem:[%s5481_s17 + $0x38] sm:$0xff]  }
 0x496   : > { %2336 = vmatpush1.bf16.msra.mxu0 %v4296_v15  ;;  %2379 = vmatpush1.bf16.msra.mxu1 %v4298_v16  ;;  %v4316_v15 = vcombine.low %v1390_v1, %v1398_v2  ;;  %v4318_v16 = vcombine.low %v1391_v3, %v1399_v6  ;;  %v4891_v1 = vld [vmem:[%s5481_s17 + $0xb0] sm:$0xff]   ;;  %v4892_v2 = vld [vmem:[%s5481_s17 + $0x68] sm:$0xff]  }
 0x497   : > { %2337 = vmatprep.subr.bf16.mxu0 %v4281_v17  ;;  %2380 = vmatprep.subr.bf16.mxu1 %v4283_v18  ;;  %v4301_v17 = vcombine.high %v1374_v22, %v1382_v11  ;;  %v4303_v18 = vcombine.high %v1375_v12, %v1383_v13  ;;  %v4893_v3 = vld [vmem:[%s5481_s17 + $0xe8] sm:$0xff]  }
 0x498   : > { %v4894_v6 = vld [vmem:[%s5481_s17 + $0x28] sm:$0xff]  }
 0x49a   : > { %2338 = vmatpush1.bf16.msra.mxu0 %v4280_v25  ;;  %2381 = vmatpush1.bf16.msra.mxu1 %v4282_v26  ;;  %v4300_v25 = vcombine.low %v1374_v22, %v1382_v11  ;;  %v4285_v26 = vcombine.high %v1358_v19, %v1366_v20  ;;  %v4900_v22 = vld [vmem:[%s5481_s17 + $0x58] sm:$0xff]   ;;  %v4908_v19 = vld [vmem:[%s5481_s17 + $0x48] sm:$0xff]  }
 0x49b   : > { %2339 = vmatprep.subr.bf16.mxu0 %v4265_v27  ;;  %2382 = vmatprep.subr.bf16.mxu1 %v4267_v28  ;;  %v4287_v27 = vcombine.high %v1359_v23, %v1367_v24  ;;  %v1342_v28 = vld [vmem:[%s5429_s23 + $0x130] sm:$0xff]  ;;  %v4901_v11 = vld [vmem:[%s5481_s17 + $0xd8] sm:$0xff]   ;;  %v4909_v20 = vld [vmem:[%s5481_s17 + $0xc8] sm:$0xff]  }
 0x49c   : > { %v4268_v39 = vcombine.low %v1342_v28, %v1350_v29 }
 0x49e   : > { %2340 = vmatpush1.bf16.msra.mxu0 %v4264_v33  ;;  %2383 = vmatpush1.bf16.msra.mxu1 %v4266_v34  ;;  %v4286_v33 = vcombine.low %v1359_v23, %v1367_v24  ;;  %v4269_v34 = vcombine.high %v1342_v28, %v1350_v29  ;;  %v4910_v23 = vld [vmem:[%s5481_s17 + $0x8] sm:$0xff]   ;;  %v4916_v28 = vld [vmem:[%s5481_s17 + $0x178] sm:$0xff]  }
 0x49f   : > { %2341 = vmatprep.subr.bf16.mxu0 %v4249_v35  ;;  %2384 = vmatprep.subr.bf16.mxu1 %v4251_v36  ;;  %v4271_v35 = vcombine.high %v1343_v30, %v1351_v31  ;;  %v1326_v36 = vld [vmem:[%s5429_s23 + $0xb0] sm:$0xff]  ;;  %v4911_v24 = vld [vmem:[%s5481_s17 + $0x88] sm:$0xff]   ;;  %v4917_v29 = vld [vmem:[%s5481_s17 + $0x1f8] sm:$0xff]  }
 0x4a0   : > { %v4252_v51 = vcombine.low %v1326_v36, %v1334_v37 }
 0x4a2   : > { %2342 = vmatpush1.bf16.msra.mxu0 %v4248_v40  ;;  %2385 = vmatpush1.bf16.msra.mxu1 %v4250_v41  ;;  %v4270_v40 = vcombine.low %v1343_v30, %v1351_v31  ;;  %v4253_v41 = vcombine.high %v1326_v36, %v1334_v37  ;;  %v1451_v30 = vsub.s32 3, %v5584_v48  ;;  %v5834_v31 = vld [vmem:[%s5467_s4] sm:$0xff] }
 0x4a3   : > { %2343 = vmatprep.subr.bf16.mxu0 %v4233_v45  ;;  %2386 = vmatprep.subr.bf16.mxu1 %v4235_v14  ;;  %v4255_v45 = vcombine.high %v1327_v38, %v1335_v10  ;;  %v1310_v14 = vld [vmem:[%s5429_s23 + $0x30] sm:$0xff]  ;;  %v1440_v36 = vrot.slane %v5834_v31, %v5587_v49  ;;  %v1448_v37 = vrot.slane %v5834_v31, %v5616_v5 }
 0x4a6   : > { %2344 = vmatpush1.bf16.msra.mxu0 %v4232_v53  ;;  %2387 = vmatpush1.bf16.msra.mxu1 %v4234_v54  ;;  %v4254_v53 = vcombine.low %v1327_v38, %v1335_v10  ;;  %v4237_v54 = vcombine.high %v1310_v14, %v1318_v46 }
 0x4a7   : > { %2415 = vmatprep.subr.bf16.mxu0 %v4349_v55  ;;  %2458 = vmatprep.subr.bf16.mxu1 %v4351_v56  ;;  %v4239_v55 = vcombine.high %v1311_v47, %v1319_v52  ;;  %v4236_v56 = vcombine.low %v1310_v14, %v1318_v46 }
 0x4a9   : > { %2362 = vmatmul.mubr.bf16.vlgmr.msra.gmra.mxu0 %v5694_v44  ;;  %2405 = vmatmul.mubr.bf16.vlgmr.msra.gmra.mxu1 %v5694_v44 }
 0x4aa   : > { %2416 = vmatpush1.bf16.msra.mxu0 %v4348_v61  ;;  %2459 = vmatpush1.bf16.msra.mxu1 %v4350_v62  ;;  %v4887_v61 = vld [vmem:[%s5481_s17 + $0xb8] sm:$0xff]   ;;  %v4888_v62 = vld [vmem:[%s5481_s17 + $0x70] sm:$0xff]  }
 0x4ab   : > { %2417 = vmatprep.subr.bf16.mxu0 %v4333_v63  ;;  %2460 = vmatprep.subr.bf16.mxu1 %v4335_v0  ;;  %v4889_v63 = vld [vmem:[%s5481_s17 + $0xf0] sm:$0xff]  }
 0x4ac   : > { %2447 = vmatprep.mubr.bf16.mxu0 %v5168_v4  ;;  %2490 = vmatprep.mubr.bf16.mxu1 %v5168_v4  ;;  %v4302_v4 = vcombine.low %v1375_v12, %v1383_v13  ;;  %v4890_v0 = vld [vmem:[%s5481_s17 + $0x30] sm:$0xff]   ;;  %v4902_v12 = vld [vmem:[%s5481_s17 + $0x18] sm:$0xff]  }
 0x4ad   : > { %v4903_v13 = vld [vmem:[%s5481_s17 + $0x98] sm:$0xff]  }
 0x4ae   : > { %2418 = vmatpush1.bf16.msra.mxu0 %v4332_v7  ;;  %2461 = vmatpush1.bf16.msra.mxu1 %v4334_v8  ;;  %v4895_v7 = vld [vmem:[%s5481_s17 + $0xa8] sm:$0xff]   ;;  %v4897_v8 = vld [vmem:[%s5481_s17 + $0xe0] sm:$0xff]  }
 0x4af   : > { %2419 = vmatprep.subr.bf16.mxu0 %v4317_v9  ;;  %2462 = vmatprep.subr.bf16.mxu1 %v4319_v21  ;;  %v4898_v9 = vld [vmem:[%s5481_s17 + $0x20] sm:$0xff]  }
 0x4b0   : > { %v4899_v21 = vld [vmem:[%s5481_s17 + $0xa0] sm:$0xff]  }
 0x4b2   : > { %2420 = vmatpush1.bf16.msra.mxu0 %v4316_v15  ;;  %2463 = vmatpush1.bf16.msra.mxu1 %v4318_v16  ;;  %v4904_v15 = vld [vmem:[%s5481_s17 + $0x50] sm:$0xff]  }
 0x4b3   : > { %2421 = vmatprep.subr.bf16.mxu0 %v4301_v17  ;;  %2464 = vmatprep.subr.bf16.mxu1 %v4303_v18  ;;  %v4905_v16 = vld [vmem:[%s5481_s17 + $0xd0] sm:$0xff]  }
 0x4b4   : > { %v4906_v17 = vld [vmem:[%s5481_s17 + $0x10] sm:$0xff]  }
 0x4b5   : > { %v4907_v18 = vld [vmem:[%s5481_s17 + $0x90] sm:$0xff]  }
 0x4b6   : > { %2422 = vmatpush1.bf16.msra.mxu0 %v4300_v25  ;;  %2465 = vmatpush1.bf16.msra.mxu1 %v4302_v4  ;;  %v4912_v25 = vld [vmem:[%s5481_s17 + $0x40] sm:$0xff]  }
 0x4b7   : > { %2423 = vmatprep.subr.bf16.mxu0 %v4285_v26  ;;  %2466 = vmatprep.subr.bf16.mxu1 %v4287_v27  ;;  %v4913_v4 = vld [vmem:[%s5481_s17 + $0xc0] sm:$0xff]  }
 0x4b8   : > { %v4914_v26 = vld [vmem:[%s5481_s17] sm:$0xff]  }
 0x4b9   : > { %v4915_v27 = vld [vmem:[%s5481_s17 + $0x80] sm:$0xff]  }
 0x4ba   : > { %2424 = vmatpush1.bf16.msra.mxu0 %v4284_v32  ;;  %2467 = vmatpush1.bf16.msra.mxu1 %v4286_v33 }
 0x4bb   : > { %2425 = vmatprep.subr.bf16.mxu0 %v4269_v34  ;;  %2468 = vmatprep.subr.bf16.mxu1 %v4271_v35  ;;  %v1444_v34 = vrot.slane %v5834_v31, %v5590_v50  ;;  %v1452_v35 = vrot.slane %v5834_v31, %v1451_v30 }
 0x4be   : > { %2426 = vmatpush1.bf16.msra.mxu0 %v4268_v39  ;;  %2469 = vmatpush1.bf16.msra.mxu1 %v4270_v40 }
 0x4bf   : > { %2427 = vmatprep.subr.bf16.mxu0 %v4253_v41  ;;  %2470 = vmatprep.subr.bf16.mxu1 %v4255_v45 }
 0x4c2   : > { %2428 = vmatpush1.bf16.msra.mxu0 %v4252_v51  ;;  %2471 = vmatpush1.bf16.msra.mxu1 %v4254_v53 }
 0x4c3   : > { %2429 = vmatprep.subr.bf16.mxu0 %v4237_v54  ;;  %2472 = vmatprep.subr.bf16.mxu1 %v4239_v55 }
 0x4c6   : > { %2430 = vmatpush1.bf16.msra.mxu0 %v4236_v56  ;;  %2473 = vmatpush1.bf16.msra.mxu1 %v4238_v57 }
 0x4c7   : > { %4529 = vmatprep.subr.bf16.mxu0 %v4884_v58  ;;  %4551 = vmatprep.subr.bf16.mxu1 %v4885_v59 }
 0x4c9   : > { %2448 = vmatmul.mubr.bf16.vlgmr.msra.gmra.mxu0 %v5694_v44  ;;  %2491 = vmatmul.mubr.bf16.vlgmr.msra.gmra.mxu1 %v5694_v44  ;;  %v4896_v44 = vld [vmem:[%s5481_s17 + $0x60] sm:$0xff]  }
 0x4ca   : > { %4530 = vmatpush3.bf16.msra.mxu0 %v4886_v60  ;;  %4552 = vmatpush3.bf16.msra.mxu1 %v4887_v61 }
 0x4cb   : > { %4531 = vmatprep.subr.bf16.mxu0 %v4888_v62  ;;  %4553 = vmatprep.subr.bf16.mxu1 %v4889_v63 }
 0x4ce   : > { %4532 = vmatpush3.bf16.msra.mxu0 %v4890_v0  ;;  %4554 = vmatpush3.bf16.msra.mxu1 %v4891_v1 }
 0x4cf   : > { %4533 = vmatprep.subr.bf16.mxu0 %v4892_v2  ;;  %4555 = vmatprep.subr.bf16.mxu1 %v4893_v3  ;;  %v4918_v2 = vld [vmem:[%s5481_s17 + $0x138] sm:$0xff]  }
 0x4d0   : > { %v4919_v3 = vld [vmem:[%s5481_s17 + $0x1b8] sm:$0xff]  }
 0x4d2   : > { %4534 = vmatpush3.bf16.msra.mxu0 %v4894_v6  ;;  %4556 = vmatpush3.bf16.msra.mxu1 %v4895_v7 }
 0x4d3   : > { %4535 = vmatprep.subr.bf16.mxu0 %v4896_v44  ;;  %4557 = vmatprep.subr.bf16.mxu1 %v4897_v8  ;;  %v4920_v44 = vld [vmem:[%s5481_s17 + $0x170] sm:$0xff]  }
 0x4d4   : > { %v4921_v8 = vld [vmem:[%s5481_s17 + $0x1f0] sm:$0xff]  }
 0x4d6   : > { %4536 = vmatpush3.bf16.msra.mxu0 %v4898_v9  ;;  %4558 = vmatpush3.bf16.msra.mxu1 %v4899_v21  ;;  %v4922_v9 = vld [vmem:[%s5481_s17 + $0x130] sm:$0xff]  }
 0x4d7   : > { %4537 = vmatprep.subr.bf16.mxu0 %v4900_v22  ;;  %4559 = vmatprep.subr.bf16.mxu1 %v4901_v11  ;;  %v4923_v21 = vld [vmem:[%s5481_s17 + $0x1b0] sm:$0xff]   ;;  %v4924_v22 = vld [vmem:[%s5481_s17 + $0x168] sm:$0xff]  }
 0x4d8   : > { %v4925_v11 = vld [vmem:[%s5481_s17 + $0x1e8] sm:$0xff]  }
 0x4da   : > { %4538 = vmatpush3.bf16.msra.mxu0 %v4902_v12  ;;  %4560 = vmatpush3.bf16.msra.mxu1 %v4903_v13  ;;  %v4926_v12 = vld [vmem:[%s5481_s17 + $0x128] sm:$0xff]  }
 0x4db   : > { %4539 = vmatprep.subr.bf16.mxu0 %v4904_v15  ;;  %4561 = vmatprep.subr.bf16.mxu1 %v4905_v16  ;;  %v4927_v13 = vld [vmem:[%s5481_s17 + $0x1a8] sm:$0xff]   ;;  %v4928_v15 = vld [vmem:[%s5481_s17 + $0x160] sm:$0xff]  }
 0x4dc   : > { %v4929_v16 = vld [vmem:[%s5481_s17 + $0x1e0] sm:$0xff]  }
 0x4de   : > { %4540 = vmatpush3.bf16.msra.mxu0 %v4906_v17  ;;  %4562 = vmatpush3.bf16.msra.mxu1 %v4907_v18  ;;  %v4930_v17 = vld [vmem:[%s5481_s17 + $0x120] sm:$0xff]  }
 0x4df   : > { %4541 = vmatprep.subr.bf16.mxu0 %v4908_v19  ;;  %4563 = vmatprep.subr.bf16.mxu1 %v4909_v20  ;;  %v4931_v18 = vld [vmem:[%s5481_s17 + $0x1a0] sm:$0xff]   ;;  %v4932_v19 = vld [vmem:[%s5481_s17 + $0x158] sm:$0xff]  }
 0x4e0   : > { %v4933_v20 = vld [vmem:[%s5481_s17 + $0x1d8] sm:$0xff]  }
 0x4e2   : > { %4542 = vmatpush3.bf16.msra.mxu0 %v4910_v23  ;;  %4564 = vmatpush3.bf16.msra.mxu1 %v4911_v24  ;;  %v4934_v23 = vld [vmem:[%s5481_s17 + $0x118] sm:$0xff]  }
 0x4e3   : > { %4543 = vmatprep.subr.bf16.mxu0 %v4912_v25  ;;  %4565 = vmatprep.subr.bf16.mxu1 %v4913_v4  ;;  %v4935_v24 = vld [vmem:[%s5481_s17 + $0x198] sm:$0xff]   ;;  %v4936_v25 = vld [vmem:[%s5481_s17 + $0x150] sm:$0xff]  }
 0x4e4   : > { %v4937_v4 = vld [vmem:[%s5481_s17 + $0x1d0] sm:$0xff]  }
 0x4e6   : > { %4544 = vmatpush3.bf16.msra.mxu0 %v4914_v26  ;;  %4566 = vmatpush3.bf16.msra.mxu1 %v4915_v27  ;;  %v1459_v26 = vsub.s32 5, %v5584_v48  ;;  %v1467_v27 = vsub.s32 7, %v5584_v48 }
 0x4e7   : > { %4573 = vmatprep.subr.bf16.mxu0 %v4916_v28  ;;  %4595 = vmatprep.subr.bf16.mxu1 %v4917_v29  ;;  %v1455_v28 = vsub.s32 4, %v5584_v48  ;;  %v1463_v29 = vsub.s32 6, %v5584_v48 }
 0x529   : > { %v2191_v32 = vpop.f32.mrf.mxu0  ;;  %v2234_v33 = vpop.f32.mrf.mxu1 }
 0x52a   : > { %v2192_v47 = vadd.f32 %v2191_v32, %v1440_v36  ;;  %v2235_v52 = vadd.f32 %v2234_v33, %v1448_v37  ;;  %v4938_v32 = vld [vmem:[%s5481_s17 + $0x110] sm:$0xff]  }
 0x52b   : > { %v2193_v38 = vpop.f32.mrf.mxu0  ;;  %v2236_v10 = vpop.f32.mrf.mxu1  ;;  %v4939_v33 = vld [vmem:[%s5481_s17 + $0x190] sm:$0xff]  }
 0x52c   : > { %v2194_v41 = vadd.f32 %v2193_v38, %v1444_v34  ;;  %v2237_v45 = vadd.f32 %v2236_v10, %v1452_v35  ;;  %v2501_v62 = vmax.f32 %v2192_v47, 0.0  ;;  %v2503_v63 = vmax.f32 %v2235_v52, 0.0 }
 0x52d   : > { %v2195_v39 = vpop.f32.mrf.mxu0  ;;  %v2238_v40 = vpop.f32.mrf.mxu1  ;;  %v1460_v38 = vrot.slane %v5834_v31, %v1459_v26  ;;  %v1468_v10 = vrot.slane %v5834_v31, %v1467_v27 }
 0x52e   : > { %v2196_v14 = vadd.f32 %v2195_v39, %v1440_v36  ;;  %v2239_v46 = vadd.f32 %v2238_v40, %v1448_v37  ;;  %v2502_v58 = vmax.f32 %v2194_v41, 0.0  ;;  %v2504_v59 = vmax.f32 %v2237_v45, 0.0  ;;  %v4940_v36 = vld [vmem:[%s5481_s17 + $0x148] sm:$0xff]  }
 0x52f   : > { %v2197_v51 = vpop.f32.mrf.mxu0  ;;  %v2240_v53 = vpop.f32.mrf.mxu1  ;;  %v4941_v37 = vld [vmem:[%s5481_s17 + $0x1c8] sm:$0xff]   ;;  %v1456_v39 = vrot.slane %v5834_v31, %v1455_v28  ;;  %v1464_v40 = vrot.slane %v5834_v31, %v1463_v29 }
 0x530   : > { %v2198_v54 = vadd.f32 %v2197_v51, %v1444_v34  ;;  %v2241_v55 = vadd.f32 %v2240_v53, %v1452_v35  ;;  %v2517_v56 = vmax.f32 %v2196_v14, 0.0  ;;  %v2519_v57 = vmax.f32 %v2239_v46, 0.0  ;;  %v4942_v14 = vld [vmem:[%s5481_s17 + $0x108] sm:$0xff]   ;;  %v4944_v51 = vld [vmem:[%s5481_s17 + $0x140] sm:$0xff]  }
 0x531   : > { %v4943_v46 = vld [vmem:[%s5481_s17 + $0x188] sm:$0xff]   ;;  %v4945_v53 = vld [vmem:[%s5481_s17 + $0x1c0] sm:$0xff]  }
 0x532   : > { %v2518_v60 = vmax.f32 %v2198_v54, 0.0  ;;  %v2520_v61 = vmax.f32 %v2241_v55, 0.0  ;;  %v2789_v6 = vpack.c.bf16 %v2517_v56, %v2501_v62  ;;  %v2791_v7 = vpack.c.bf16 %v2519_v57, %v2503_v63  ;;  %v4946_v63 = vld [vmem:[%s5481_s17 + $0x100] sm:$0xff]  }
 0x534   : > { %v2790_v0 = vpack.c.bf16 %v2518_v60, %v2502_v58  ;;  %v2792_v1 = vpack.c.bf16 %v2520_v61, %v2504_v59 }
 0x536   : > { %3605 = vmatprep.mubr.bf16.mxu0 %v2790_v0  ;;  %3646 = vmatprep.mubr.bf16.mxu1 %v2792_v1  ;;  %v4947_v0 = vld [vmem:[%s5481_s17 + $0x180] sm:$0xff]  }
 0x537   : > { %3606 = vmatmul.mubr.bf16.vlgmr.msra.gmra.mxu0 %v2789_v6  ;;  %3647 = vmatmul.mubr.bf16.vlgmr.msra.gmra.mxu1 %v2791_v7  ;;  %v4949_v6 = vld [vmem:[%s5481_s17 + $0x2f8] sm:$0xff]  }
 0x538   : > { %4574 = vmatpush3.bf16.msra.mxu0 %v4918_v2  ;;  %4596 = vmatpush3.bf16.msra.mxu1 %v4919_v3  ;;  %v4948_v3 = vld [vmem:[%s5481_s17 + $0x278] sm:$0xff]  }
 0x539   : > { %4575 = vmatprep.subr.bf16.mxu0 %v4920_v44  ;;  %4597 = vmatprep.subr.bf16.mxu1 %v4921_v8 }
 0x53c   : > { %4576 = vmatpush3.bf16.msra.mxu0 %v4922_v9  ;;  %4598 = vmatpush3.bf16.msra.mxu1 %v4923_v21 }
 0x53d   : > { %4577 = vmatprep.subr.bf16.mxu0 %v4924_v22  ;;  %4599 = vmatprep.subr.bf16.mxu1 %v4925_v11 }
 0x540   : > { %4578 = vmatpush3.bf16.msra.mxu0 %v4926_v12  ;;  %4600 = vmatpush3.bf16.msra.mxu1 %v4927_v13  ;;  %v4950_v13 = vld [vmem:[%s5481_s17 + $0x238] sm:$0xff]  }
 0x541   : > { %4579 = vmatprep.subr.bf16.mxu0 %v4928_v15  ;;  %4601 = vmatprep.subr.bf16.mxu1 %v4929_v16  ;;  %v4951_v15 = vld [vmem:[%s5481_s17 + $0x2b8] sm:$0xff]  }
 0x544   : > { %4580 = vmatpush3.bf16.msra.mxu0 %v4930_v17  ;;  %4602 = vmatpush3.bf16.msra.mxu1 %v4931_v18  ;;  %v4952_v18 = vld [vmem:[%s5481_s17 + $0x270] sm:$0xff]  }
 0x545   : > { %4581 = vmatprep.subr.bf16.mxu0 %v4932_v19  ;;  %4603 = vmatprep.subr.bf16.mxu1 %v4933_v20  ;;  %v4953_v19 = vld [vmem:[%s5481_s17 + $0x2f0] sm:$0xff]  }
 0x546   : > { %v4954_v20 = vld [vmem:[%s5481_s17 + $0x230] sm:$0xff]  }
 0x548   : > { %4582 = vmatpush3.bf16.msra.mxu0 %v4934_v23  ;;  %4604 = vmatpush3.bf16.msra.mxu1 %v4935_v24  ;;  %v4955_v23 = vld [vmem:[%s5481_s17 + $0x2b0] sm:$0xff]   ;;  %v4956_v24 = vld [vmem:[%s5481_s17 + $0x268] sm:$0xff]  }
 0x549   : > { %v2277_v34 = vpop.f32.mrf.mxu0  ;;  %v2320_v35 = vpop.f32.mrf.mxu1  ;;  %4583 = vmatprep.subr.bf16.mxu0 %v4936_v25  ;;  %4605 = vmatprep.subr.bf16.mxu1 %v4937_v4  ;;  %v4957_v25 = vld [vmem:[%s5481_s17 + $0x2e8] sm:$0xff]  }
 0x54a   : > { %v2278_v31 = vadd.f32 %v2277_v34, %v1456_v39  ;;  %v2321_v58 = vadd.f32 %v2320_v35, %v1464_v40  ;;  %v4958_v4 = vld [vmem:[%s5481_s17 + $0x228] sm:$0xff]   ;;  %v4961_v34 = vld [vmem:[%s5481_s17 + $0x2e0] sm:$0xff]  }
 0x54b   : > { %v2279_v41 = vpop.f32.mrf.mxu0  ;;  %v2322_v45 = vpop.f32.mrf.mxu1  ;;  %v4962_v35 = vld [vmem:[%s5481_s17 + $0x220] sm:$0xff]  }
 0x54c   : > { %4584 = vmatpush3.bf16.msra.mxu0 %v4938_v32  ;;  %4606 = vmatpush3.bf16.msra.mxu1 %v4939_v33  ;;  %v2280_v54 = vadd.f32 %v2279_v41, %v1460_v38  ;;  %v2323_v55 = vadd.f32 %v2322_v45, %v1468_v10  ;;  %v2505_v21 = vmax.f32 %v2278_v31, 0.0  ;;  %v2507_v22 = vmax.f32 %v2321_v58, 0.0  ;;  %v4959_v32 = vld [vmem:[%s5481_s17 + $0x2a8] sm:$0xff]   ;;  %v4960_v33 = vld [vmem:[%s5481_s17 + $0x260] sm:$0xff]   ;;  %v4969_v41 = vld [vmem:[%s5481_s17 + $0x2d0] sm:$0xff]  }
 0x54d   : > { %v2281_v47 = vpop.f32.mrf.mxu0  ;;  %v2324_v52 = vpop.f32.mrf.mxu1  ;;  %4585 = vmatprep.subr.bf16.mxu0 %v4940_v36  ;;  %4607 = vmatprep.subr.bf16.mxu1 %v4941_v37  ;;  %v4963_v36 = vld [vmem:[%s5481_s17 + $0x2a0] sm:$0xff]   ;;  %v4964_v37 = vld [vmem:[%s5481_s17 + $0x258] sm:$0xff]  }
 0x54e   : > { %v2282_v56 = vadd.f32 %v2281_v47, %v1456_v39  ;;  %v2325_v57 = vadd.f32 %v2324_v52, %v1464_v40  ;;  %v2506_v7 = vmax.f32 %v2280_v54, 0.0  ;;  %v2508_v44 = vmax.f32 %v2323_v55, 0.0  ;;  %v4967_v39 = vld [vmem:[%s5481_s17 + $0x298] sm:$0xff]   ;;  %v4968_v40 = vld [vmem:[%s5481_s17 + $0x250] sm:$0xff]  }
 0x54f   : > { %v2283_v59 = vpop.f32.mrf.mxu0  ;;  %v2326_v60 = vpop.f32.mrf.mxu1  ;;  %v5914_v45 = vld [vmem:[%s5467_s4 + $0x8] sm:$0xff] }
 0x550   : > { %v2284_v61 = vadd.f32 %v2283_v59, %v1460_v38  ;;  %v2327_v62 = vadd.f32 %v2326_v60, %v1468_v10  ;;  %4586 = vmatpush3.bf16.msra.mxu0 %v4942_v14  ;;  %4608 = vmatpush3.bf16.msra.mxu1 %v4943_v46  ;;  %v2521_v1 = vmax.f32 %v2282_v56, 0.0  ;;  %v2523_v2 = vmax.f32 %v2325_v57, 0.0  ;;  %v4965_v38 = vld [vmem:[%s5481_s17 + $0x2d8] sm:$0xff]   ;;  %v4970_v14 = vld [vmem:[%s5481_s17 + $0x210] sm:$0xff]   ;;  %v4974_v59 = vld [vmem:[%s5481_s17 + $0x208] sm:$0xff]  }
 0x551   : > { %4587 = vmatprep.subr.bf16.mxu0 %v4944_v51  ;;  %4609 = vmatprep.subr.bf16.mxu1 %v4945_v53  ;;  %v4966_v10 = vld [vmem:[%s5481_s17 + $0x218] sm:$0xff]   ;;  %v4971_v46 = vld [vmem:[%s5481_s17 + $0x290] sm:$0xff]   ;;  %v4972_v51 = vld [vmem:[%s5481_s17 + $0x248] sm:$0xff]   ;;  %v1476_v54 = vrot.slane %v5914_v45, %v5590_v50  ;;  %v1484_v55 = vrot.slane %v5914_v45, %v1451_v30  ;;  %v1472_v56 = vrot.slane %v5914_v45, %v5587_v49 }
 0x552   : > { %v2522_v8 = vmax.f32 %v2284_v61, 0.0  ;;  %v2524_v9 = vmax.f32 %v2327_v62, 0.0  ;;  %v2793_v16 = vpack.c.bf16 %v2521_v1, %v2505_v21  ;;  %v2795_v17 = vpack.c.bf16 %v2523_v2, %v2507_v22  ;;  %v4973_v53 = vld [vmem:[%s5481_s17 + $0x2c8] sm:$0xff]   ;;  %v4976_v50 = vld [vmem:[%s5481_s17 + $0x240] sm:$0xff]  }
 0x553   : > { %v1480_v57 = vrot.slane %v5914_v45, %v5616_v5  ;;  %v4975_v60 = vld [vmem:[%s5481_s17 + $0x288] sm:$0xff]   ;;  %v4977_v30 = vld [vmem:[%s5481_s17 + $0x2c0] sm:$0xff]  }
 0x554   : > { %v2794_v11 = vpack.c.bf16 %v2522_v8, %v2506_v7  ;;  %v2796_v12 = vpack.c.bf16 %v2524_v9, %v2508_v44  ;;  %4588 = vmatpush3.bf16.msra.mxu0 %v4946_v63  ;;  %4610 = vmatpush3.bf16.msra.mxu1 %v4947_v0  ;;  %v4978_v8 = vld [vmem:[%s5481_s17 + $0x200] sm:$0xff]  }
 0x555   : > { %4617 = vmatprep.subr.bf16.mxu0 %v4948_v3  ;;  %4639 = vmatprep.subr.bf16.mxu1 %v4949_v6  ;;  %v4979_v9 = vld [vmem:[%s5481_s17 + $0x280] sm:$0xff]  }
 0x556   : > { %3687 = vmatprep.mubr.bf16.mxu0 %v2794_v11  ;;  %3728 = vmatprep.mubr.bf16.mxu1 %v2796_v12  ;;  %v4980_v11 = vld [vmem:[%s5481_s17 + $0x378] sm:$0xff]  }
 0x557   : > { %3688 = vmatmul.mubr.bf16.vlgmr.msra.gmra.mxu0 %v2793_v16  ;;  %3729 = vmatmul.mubr.bf16.vlgmr.msra.gmra.mxu1 %v2795_v17  ;;  %v4981_v12 = vld [vmem:[%s5481_s17 + $0x3f8] sm:$0xff]  }
 0x558   : > { %4618 = vmatpush3.bf16.msra.mxu0 %v4950_v13  ;;  %4640 = vmatpush3.bf16.msra.mxu1 %v4951_v15 }
 0x559   : > { %4619 = vmatprep.subr.bf16.mxu0 %v4952_v18  ;;  %4641 = vmatprep.subr.bf16.mxu1 %v4953_v19 }
 0x55c   : > { %4620 = vmatpush3.bf16.msra.mxu0 %v4954_v20  ;;  %4642 = vmatpush3.bf16.msra.mxu1 %v4955_v23 }
 0x55d   : > { %4621 = vmatprep.subr.bf16.mxu0 %v4956_v24  ;;  %4643 = vmatprep.subr.bf16.mxu1 %v4957_v25  ;;  %v4982_v24 = vld [vmem:[%s5481_s17 + $0x338] sm:$0xff]  }
 0x55e   : > { %v4983_v25 = vld [vmem:[%s5481_s17 + $0x3b8] sm:$0xff]  }
 0x560   : > { %4622 = vmatpush3.bf16.msra.mxu0 %v4958_v4  ;;  %4644 = vmatpush3.bf16.msra.mxu1 %v4959_v32 }
 0x561   : > { %4623 = vmatprep.subr.bf16.mxu0 %v4960_v33  ;;  %4645 = vmatprep.subr.bf16.mxu1 %v4961_v34  ;;  %v4984_v33 = vld [vmem:[%s5481_s17 + $0x370] sm:$0xff]  }
 0x562   : > { %v4985_v34 = vld [vmem:[%s5481_s17 + $0x3f0] sm:$0xff]  }
 0x564   : > { %4624 = vmatpush3.bf16.msra.mxu0 %v4962_v35  ;;  %4646 = vmatpush3.bf16.msra.mxu1 %v4963_v36  ;;  %v4986_v35 = vld [vmem:[%s5481_s17 + $0x330] sm:$0xff]  }
 0x565   : > { %4625 = vmatprep.subr.bf16.mxu0 %v4964_v37  ;;  %4647 = vmatprep.subr.bf16.mxu1 %v4965_v38  ;;  %v4987_v36 = vld [vmem:[%s5481_s17 + $0x3b0] sm:$0xff]   ;;  %v4988_v37 = vld [vmem:[%s5481_s17 + $0x368] sm:$0xff]  }
 0x566   : > { %v4989_v38 = vld [vmem:[%s5481_s17 + $0x3e8] sm:$0xff]  }
 0x568   : > { %4626 = vmatpush3.bf16.msra.mxu0 %v4966_v10  ;;  %4648 = vmatpush3.bf16.msra.mxu1 %v4967_v39  ;;  %v4990_v10 = vld [vmem:[%s5481_s17 + $0x328] sm:$0xff]  }
 0x569   : > { %v2363_v47 = vpop.f32.mrf.mxu0  ;;  %v2406_v52 = vpop.f32.mrf.mxu1  ;;  %4627 = vmatprep.subr.bf16.mxu0 %v4968_v40  ;;  %4649 = vmatprep.subr.bf16.mxu1 %v4969_v41  ;;  %v4991_v39 = vld [vmem:[%s5481_s17 + $0x3a8] sm:$0xff]   ;;  %v4992_v40 = vld [vmem:[%s5481_s17 + $0x360] sm:$0xff]  }
 0x56a   : > { %v2364_v5 = vadd.f32 %v2363_v47, %v1472_v56  ;;  %v2407_v2 = vadd.f32 %v2406_v52, %v1480_v57  ;;  %v4993_v41 = vld [vmem:[%s5481_s17 + $0x3e0] sm:$0xff]   ;;  %v4996_v47 = vld [vmem:[%s5481_s17 + $0x358] sm:$0xff]  }
 0x56b   : > { %v2365_v31 = vpop.f32.mrf.mxu0  ;;  %v2408_v58 = vpop.f32.mrf.mxu1  ;;  %v4997_v52 = vld [vmem:[%s5481_s17 + $0x3d8] sm:$0xff]  }
 0x56c   : > { %4628 = vmatpush3.bf16.msra.mxu0 %v4970_v14  ;;  %4650 = vmatpush3.bf16.msra.mxu1 %v4971_v46  ;;  %v2366_v63 = vadd.f32 %v2365_v31, %v1476_v54  ;;  %v2409_v0 = vadd.f32 %v2408_v58, %v1484_v55  ;;  %v2509_v18 = vmax.f32 %v2364_v5, 0.0  ;;  %v2511_v19 = vmax.f32 %v2407_v2, 0.0  ;;  %v4994_v14 = vld [vmem:[%s5481_s17 + $0x320] sm:$0xff]  }
 0x56d   : > { %v2367_v61 = vpop.f32.mrf.mxu0  ;;  %v2410_v62 = vpop.f32.mrf.mxu1  ;;  %4629 = vmatprep.subr.bf16.mxu0 %v4972_v51  ;;  %4651 = vmatprep.subr.bf16.mxu1 %v4973_v53  ;;  %v4995_v46 = vld [vmem:[%s5481_s17 + $0x3a0] sm:$0xff]   ;;  %v4998_v51 = vld [vmem:[%s5481_s17 + $0x318] sm:$0xff]  }
 0x56e   : > { %v2368_v49 = vadd.f32 %v2367_v61, %v1472_v56  ;;  %v2411_v1 = vadd.f32 %v2410_v62, %v1480_v57  ;;  %v2510_v13 = vmax.f32 %v2366_v63, 0.0  ;;  %v2512_v15 = vmax.f32 %v2409_v0, 0.0  ;;  %v4999_v53 = vld [vmem:[%s5481_s17 + $0x398] sm:$0xff]   ;;  %v5002_v56 = vld [vmem:[%s5481_s17 + $0x310] sm:$0xff]   ;;  %v5009_v2 = vld [vmem:[%s5481_s17 + $0x3c0] sm:$0xff]  }
 0x56f   : > { %v2369_v3 = vpop.f32.mrf.mxu0  ;;  %v2412_v6 = vpop.f32.mrf.mxu1  ;;  %v5003_v57 = vld [vmem:[%s5481_s17 + $0x390] sm:$0xff]   ;;  %v1492_v61 = vrot.slane %v5914_v45, %v1459_v26  ;;  %v1500_v62 = vrot.slane %v5914_v45, %v1467_v27  ;;  %v5008_v27 = vld [vmem:[%s5481_s17 + $0x340] sm:$0xff]  }
 0x570   : > { %v2370_v7 = vadd.f32 %v2369_v3, %v1476_v54  ;;  %v2413_v44 = vadd.f32 %v2412_v6, %v1484_v55  ;;  %4630 = vmatpush3.bf16.msra.mxu0 %v4974_v59  ;;  %4652 = vmatpush3.bf16.msra.mxu1 %v4975_v60  ;;  %v2525_v21 = vmax.f32 %v2368_v49, 0.0  ;;  %v2527_v22 = vmax.f32 %v2411_v1, 0.0  ;;  %v5000_v54 = vld [vmem:[%s5481_s17 + $0x350] sm:$0xff]   ;;  %v5004_v59 = vld [vmem:[%s5481_s17 + $0x348] sm:$0xff]  }
 0x571   : > { %4631 = vmatprep.subr.bf16.mxu0 %v4976_v50  ;;  %4653 = vmatprep.subr.bf16.mxu1 %v4977_v30  ;;  %v5001_v55 = vld [vmem:[%s5481_s17 + $0x3d0] sm:$0xff]   ;;  %v5005_v60 = vld [vmem:[%s5481_s17 + $0x3c8] sm:$0xff]   ;;  %v1488_v50 = vrot.slane %v5914_v45, %v1455_v28  ;;  %v1496_v30 = vrot.slane %v5914_v45, %v1463_v29 }
 0x572   : > { %v2526_v16 = vmax.f32 %v2370_v7, 0.0  ;;  %v2528_v17 = vmax.f32 %v2413_v44, 0.0  ;;  %v2797_v4 = vpack.c.bf16 %v2525_v21, %v2509_v18  ;;  %v2799_v32 = vpack.c.bf16 %v2527_v22, %v2511_v19  ;;  %v5006_v49 = vld [vmem:[%s5481_s17 + $0x308] sm:$0xff]   ;;  %v5010_v21 = vld [vmem:[%s5481_s17 + $0x300] sm:$0xff]  }
 0x573   : > { %v5007_v1 = vld [vmem:[%s5481_s17 + $0x388] sm:$0xff]   ;;  %v5011_v22 = vld [vmem:[%s5481_s17 + $0x380] sm:$0xff]  }
 0x574   : > { %v2798_v20 = vpack.c.bf16 %v2526_v16, %v2510_v13  ;;  %v2800_v23 = vpack.c.bf16 %v2528_v17, %v2512_v15  ;;  %4632 = vmatpush3.bf16.msra.mxu0 %v4978_v8  ;;  %4654 = vmatpush3.bf16.msra.mxu1 %v4979_v9 }
 0x575   : > { %4661 = vmatprep.subr.bf16.mxu0 %v4980_v11  ;;  %4683 = vmatprep.subr.bf16.mxu1 %v4981_v12 }
 0x576   : > { %3769 = vmatprep.mubr.bf16.mxu0 %v2798_v20  ;;  %3810 = vmatprep.mubr.bf16.mxu1 %v2800_v23 }
 0x577   : > { %3770 = vmatmul.mubr.bf16.vlgmr.msra.gmra.mxu0 %v2797_v4  ;;  %3811 = vmatmul.mubr.bf16.vlgmr.msra.gmra.mxu1 %v2799_v32 }
 0x578   : > { %4662 = vmatpush3.bf16.msra.mxu0 %v4982_v24  ;;  %4684 = vmatpush3.bf16.msra.mxu1 %v4983_v25 }
 0x579   : > { %4663 = vmatprep.subr.bf16.mxu0 %v4984_v33  ;;  %4685 = vmatprep.subr.bf16.mxu1 %v4985_v34 }
 0x57c   : > { %4664 = vmatpush3.bf16.msra.mxu0 %v4986_v35  ;;  %4686 = vmatpush3.bf16.msra.mxu1 %v4987_v36 }
 0x57d   : > { %4665 = vmatprep.subr.bf16.mxu0 %v4988_v37  ;;  %4687 = vmatprep.subr.bf16.mxu1 %v4989_v38 }
 0x580   : > { %4666 = vmatpush3.bf16.msra.mxu0 %v4990_v10  ;;  %4688 = vmatpush3.bf16.msra.mxu1 %v4991_v39 }
 0x581   : > { %4667 = vmatprep.subr.bf16.mxu0 %v4992_v40  ;;  %4689 = vmatprep.subr.bf16.mxu1 %v4993_v41 }
 0x584   : > { %4668 = vmatpush3.bf16.msra.mxu0 %v4994_v14  ;;  %4690 = vmatpush3.bf16.msra.mxu1 %v4995_v46 }
 0x585   : > { %4669 = vmatprep.subr.bf16.mxu0 %v4996_v47  ;;  %4691 = vmatprep.subr.bf16.mxu1 %v4997_v52 }
 0x588   : > { %4670 = vmatpush3.bf16.msra.mxu0 %v4998_v51  ;;  %4692 = vmatpush3.bf16.msra.mxu1 %v4999_v53 }
 0x589   : > { %v2449_v31 = vpop.f32.mrf.mxu0  ;;  %v2492_v58 = vpop.f32.mrf.mxu1  ;;  %4671 = vmatprep.subr.bf16.mxu0 %v5000_v54  ;;  %4693 = vmatprep.subr.bf16.mxu1 %v5001_v55 }
 0x58a   : > { %v2450_v7 = vadd.f32 %v2449_v31, %v1488_v50  ;;  %v2493_v29 = vadd.f32 %v2492_v58, %v1496_v30 }
 0x58b   : > { %v2451_v63 = vpop.f32.mrf.mxu0  ;;  %v2494_v0 = vpop.f32.mrf.mxu1 }
 0x58c   : > { %4672 = vmatpush3.bf16.msra.mxu0 %v5002_v56  ;;  %4694 = vmatpush3.bf16.msra.mxu1 %v5003_v57  ;;  %v2452_v3 = vadd.f32 %v2451_v63, %v1492_v61  ;;  %v2495_v28 = vadd.f32 %v2494_v0, %v1500_v62  ;;  %v2513_v18 = vmax.f32 %v2450_v7, 0.0  ;;  %v2515_v19 = vmax.f32 %v2493_v29, 0.0 }
 0x58d   : > { %v2453_v5 = vpop.f32.mrf.mxu0  ;;  %v2496_v26 = vpop.f32.mrf.mxu1  ;;  %4673 = vmatprep.subr.bf16.mxu0 %v5004_v59  ;;  %4695 = vmatprep.subr.bf16.mxu1 %v5005_v60 }
 0x58e   : > { %v2454_v6 = vadd.f32 %v2453_v5, %v1488_v50  ;;  %v2497_v48 = vadd.f32 %v2496_v26, %v1496_v30  ;;  %v2514_v13 = vmax.f32 %v2452_v3, 0.0  ;;  %v2516_v15 = vmax.f32 %v2495_v28, 0.0 }
 0x58f   : > { %v2455_v45 = vpop.f32.mrf.mxu0  ;;  %v2498_v44 = vpop.f32.mrf.mxu1 }
 0x590   : > { %v2456_v8 = vadd.f32 %v2455_v45, %v1492_v61  ;;  %v2499_v9 = vadd.f32 %v2498_v44, %v1500_v62  ;;  %4674 = vmatpush3.bf16.msra.mxu0 %v5006_v49  ;;  %4696 = vmatpush3.bf16.msra.mxu1 %v5007_v1  ;;  %v2529_v11 = vmax.f32 %v2454_v6, 0.0  ;;  %v2531_v12 = vmax.f32 %v2497_v48, 0.0 }
 0x591   : > { %4675 = vmatprep.subr.bf16.mxu0 %v5008_v27  ;;  %4697 = vmatprep.subr.bf16.mxu1 %v5009_v2 }
 0x592   : > { %v2530_v16 = vmax.f32 %v2456_v8, 0.0  ;;  %v2532_v17 = vmax.f32 %v2499_v9, 0.0  ;;  %v2801_v24 = vpack.c.bf16 %v2529_v11, %v2513_v18  ;;  %v2803_v25 = vpack.c.bf16 %v2531_v12, %v2515_v19 }
 0x594   : > { %v2802_v20 = vpack.c.bf16 %v2530_v16, %v2514_v13  ;;  %v2804_v23 = vpack.c.bf16 %v2532_v17, %v2516_v15  ;;  %4676 = vmatpush3.bf16.msra.mxu0 %v5010_v21  ;;  %4698 = vmatpush3.bf16.msra.mxu1 %v5011_v22 }
 0x596   : > { %3851 = vmatprep.mubr.bf16.mxu0 %v2802_v20  ;;  %3892 = vmatprep.mubr.bf16.mxu1 %v2804_v23  ;;  %v4480_v23 = vld [vmem:[%s735_s29] ss:$0 sm:$0xff] }
 0x597   : > { %3852 = vmatmul.mubr.bf16.vlgmr.msra.gmra.mxu0 %v2801_v24  ;;  %3893 = vmatmul.mubr.bf16.vlgmr.msra.gmra.mxu1 %v2803_v25 }
 0x5f7   : > { %v4545_v4 = vpop.f32.mrf.mxu0  ;;  %v4567_v32 = vpop.f32.mrf.mxu1 }
 0x5f9   : > { %v4546_v33 = vpop.f32.mrf.mxu0  ;;  %v4568_v34 = vpop.f32.mrf.mxu1 }
 0x5fa   : > { %v4547_v54 = vadd.f32 %v4546_v33, %v4545_v4  ;;  %v4569_v55 = vadd.f32 %v4568_v34, %v4567_v32 }
 0x5fb   : > { %v4548_v35 = vpop.f32.mrf.mxu0  ;;  %v4570_v36 = vpop.f32.mrf.mxu1 }
 0x5fc   : > { %v3649_v58 = vadd.f32 %v4569_v55, %v4547_v54  ;;  %v4481_v54 = vld [vmem:[%s738_s3] ss:$0 sm:$0xff] }
 0x5fd   : > { %v4549_v37 = vpop.f32.mrf.mxu0  ;;  %v4571_v38 = vpop.f32.mrf.mxu1 }
 0x5fe   : > { %v4550_v59 = vadd.f32 %v4549_v37, %v4548_v35  ;;  %v4572_v60 = vadd.f32 %v4571_v38, %v4570_v36 }
 0x600   : > { %v3652_v63 = vadd.f32 %v4572_v60, %v4550_v59 }
 0x617   : > { %v4589_v10 = vpop.f32.mrf.mxu0  ;;  %v4611_v39 = vpop.f32.mrf.mxu1 }
 0x619   : > { %v4590_v40 = vpop.f32.mrf.mxu0  ;;  %v4612_v41 = vpop.f32.mrf.mxu1 }
 0x61a   : > { %v4591_v57 = vadd.f32 %v4590_v40, %v4589_v10  ;;  %v4613_v0 = vadd.f32 %v4612_v41, %v4611_v39 }
 0x61b   : > { %v4592_v14 = vpop.f32.mrf.mxu0  ;;  %v4614_v46 = vpop.f32.mrf.mxu1 }
 0x61c   : > { %v3690_v62 = vadd.f32 %v4591_v57, %v3649_v58 }
 0x61d   : > { %v4593_v47 = vpop.f32.mrf.mxu0  ;;  %v4615_v52 = vpop.f32.mrf.mxu1 }
 0x61e   : > { %v4594_v50 = vadd.f32 %v4593_v47, %v4592_v14  ;;  %v3731_v5 = vadd.f32 %v4613_v0, %v3690_v62  ;;  %v4616_v2 = vadd.f32 %v4615_v52, %v4614_v46 }
 0x620   : > { %v3693_v26 = vadd.f32 %v4594_v50, %v3652_v63 }
 0x622   : > { %v3734_v7 = vadd.f32 %v4616_v2, %v3693_v26 }
 0x637   : > { %v4633_v51 = vpop.f32.mrf.mxu0  ;;  %v4655_v53 = vpop.f32.mrf.mxu1 }
 0x639   : > { %v4634_v56 = vpop.f32.mrf.mxu0  ;;  %v4656_v31 = vpop.f32.mrf.mxu1 }
 0x63a   : > { %v4635_v49 = vadd.f32 %v4634_v56, %v4633_v51  ;;  %v4657_v29 = vadd.f32 %v4656_v31, %v4655_v53  ;;  %v4482_v56 = vld [vmem:[%s741_s10] ss:$0 sm:$0xff] }
 0x63b   : > { %v4636_v61 = vpop.f32.mrf.mxu0  ;;  %v4658_v30 = vpop.f32.mrf.mxu1 }
 0x63c   : > { %v3772_v3 = vadd.f32 %v4635_v49, %v3731_v5 }
 0x63d   : > { %v4637_v1 = vpop.f32.mrf.mxu0  ;;  %v4659_v27 = vpop.f32.mrf.mxu1 }
 0x63e   : > { %v4638_v28 = vadd.f32 %v4637_v1, %v4636_v61  ;;  %v3813_v8 = vadd.f32 %v4657_v29, %v3772_v3  ;;  %v4660_v12 = vadd.f32 %v4659_v27, %v4658_v30 }
 0x640   : > { %v3775_v9 = vadd.f32 %v4638_v28, %v3734_v7 }
 0x642   : > { %v3816_v18 = vadd.f32 %v4660_v12, %v3775_v9 }
 0x657   : > { %v4677_v6 = vpop.f32.mrf.mxu0  ;;  %v4699_v48 = vpop.f32.mrf.mxu1 }
 0x659   : > { %v4678_v45 = vpop.f32.mrf.mxu0  ;;  %v4700_v44 = vpop.f32.mrf.mxu1 }
 0x65a   : > { %v4679_v21 = vadd.f32 %v4678_v45, %v4677_v6  ;;  %v4701_v15 = vadd.f32 %v4700_v44, %v4699_v48 }
 0x65b   : > { %v4680_v22 = vpop.f32.mrf.mxu0  ;;  %v4702_v11 = vpop.f32.mrf.mxu1 }
 0x65c   : > { %v3854_v13 = vadd.f32 %v4679_v21, %v3813_v8 }
 0x65d   : > { %v4681_v16 = vpop.f32.mrf.mxu0  ;;  %v4703_v17 = vpop.f32.mrf.mxu1 }
 0x65e   : > { %v3895_v19 = vadd.f32 %v4701_v15, %v3854_v13  ;;  %v4682_v20 = vadd.f32 %v4681_v16, %v4680_v22  ;;  %v4704_v25 = vadd.f32 %v4703_v17, %v4702_v11 }
 0x660   : > { %v3857_v24 = vadd.f32 %v4682_v20, %v3816_v18  ;;  %v3901_v4 = vadd.f32 %v3895_v19, %v5688_v42 }
 0x662   : > { %v3898_v32 = vadd.f32 %v4704_v25, %v3857_v24  ;;  %v3910_v33 = vadd.f32 %v4480_v23, %v3901_v4 }
 0x664   : > { %3914 = vadd.xlane.f32.xlu0 %v3910_v33  ;;  %v3902_v34 = vadd.f32 %v3898_v32, %v5690_v43 }
 0x666   : > { %v3911_v35 = vadd.f32 %v4480_v23, %v3902_v34 }
 0x668   : > { %3916 = vadd.xlane.f32.xlu1 %v3911_v35 }
 0x6ed   : > { %v3915_v36 = vpop.xlane.xlu0 %3914 }
 0x6ee   : > { %v3918_v37 = vmul.f32 0.0078125, %v3915_v36 }
 0x6f0   : > { %v3920_v38 = vsub.f32 %v3910_v33, %v3918_v37 }
 0x6f1   : > { %v3917_v10 = vpop.xlane.xlu1 %3916 }
 0x6f2   : > { %v3919_v39 = vmul.f32 0.0078125, %v3917_v10  ;;  %v3922_v40 = vmul.f32 %v3920_v38, %v3920_v38 }
 0x6f4   : > { %v3921_v41 = vsub.f32 %v3911_v35, %v3919_v39  ;;  %3924 = vadd.xlane.f32.xlu0 %v3922_v40 }
 0x6f6   : > { %v3923_v14 = vmul.f32 %v3921_v41, %v3921_v41 }
 0x6f8   : > { %3926 = vadd.xlane.f32.xlu1 %v3923_v14 }
 0x77d   : > { %v3925_v42 = vpop.xlane.xlu0 %3924 }
 0x77e   : > { %v3928_v46 = vmul.f32 0.0078125, %v3925_v42 }
 0x780   : > { %v3930_v47 = vadd.f32 1e-05, %v3928_v46 }
 0x781   : > { %v3927_v52 = vpop.xlane.xlu1 %3926 }
 0x782   : > { %5028 = vrsqrt.f32 %v3930_v47  ;;  %v3929_v43 = vmul.f32 0.0078125, %v3927_v52 }
 0x784   : > { %v3931_v51 = vadd.f32 1e-05, %v3929_v43 }
 0x786   : > { %5030 = vrsqrt.f32 %v3931_v51 }
 0x78f   : > { %v5029_v53 = vpop.eup %5028 }
 0x790   : > { %v3934_v55 = vmul.f32 %v5029_v53, %v3920_v38 }
 0x792   : > { %v3942_v57 = vmul.f32 %v4481_v54, %v3934_v55 }
 0x793   : > { %v5031_v31 = vpop.eup %5030 }
 0x794   : > { %v3950_v58 = vadd.f32 %v4482_v56, %v3942_v57  ;;  %v3935_v59 = vmul.f32 %v5031_v31, %v3921_v41 }
 0x796   : > { %3952 = vst [vmem:[#allocation2] sm:$0xff] %v3950_v58  ;;  %v3943_v60 = vmul.f32 %v4481_v54, %v3935_v59  ;;  %3957 = sbr.rel (%p4483_p5) target bundleno = 2258 (0x8d2), region = 104 }
 0x798   : > { %v3951_v61 = vadd.f32 %v4482_v56, %v3943_v60 }
 0x79a   : > { %3953 = vst [vmem:[#allocation2 + $0x8] sm:$0xff] %v3951_v61 }
 0x79b   : > { %3960 = vadd.xlane.f32.xlu0 %v3950_v58  ;;  %v4484_v7 = vld [vmem:[%s6087_s25] ss:$0 sm:$0xff] }
 0x79c   : > { %v4485_v45 = vld [vmem:[%s6088_s14] ss:$0 sm:$0xff] }
 0x79f   : > { %3962 = vadd.xlane.f32.xlu0 %v3951_v61 }
 0x824   : > { %v3961_v62 = vpop.xlane.xlu0 %3960 }
 0x825   : > { %v3964_v50 = vmul.f32 0.0078125, %v3961_v62 }
 0x827   : > { %v3966_v30 = vsub.f32 %v3950_v58, %v3964_v50 }
 0x828   : > { %v3963_v63 = vpop.xlane.xlu0 %3962 }
 0x829   : > { %v3965_v0 = vmul.f32 0.0078125, %v3963_v63  ;;  %v3968_v49 = vmul.f32 %v3966_v30, %v3966_v30 }
 0x82b   : > { %v3967_v1 = vsub.f32 %v3951_v61, %v3965_v0  ;;  %3970 = vadd.xlane.f32.xlu1 %v3968_v49 }
 0x82d   : > { %v3969_v5 = vmul.f32 %v3967_v1, %v3967_v1 }
 0x82f   : > { %3972 = vadd.xlane.f32.xlu1 %v3969_v5 }
 0x8b4   : > { %v3971_v26 = vpop.xlane.xlu1 %3970 }
 0x8b5   : > { %v3974_v27 = vmul.f32 0.0078125, %v3971_v26 }
 0x8b7   : > { %v3976_v2 = vadd.f32 1e-05, %v3974_v27 }
 0x8b8   : > { %v3973_v3 = vpop.xlane.xlu1 %3972 }
 0x8b9   : > { %5032 = vrsqrt.f32 %v3976_v2  ;;  %v3975_v28 = vmul.f32 0.0078125, %v3973_v3 }
 0x8bb   : > { %v3977_v6 = vadd.f32 1e-05, %v3975_v28 }
 0x8bd   : > { %5034 = vrsqrt.f32 %v3977_v6 }
 0x8c6   : > { %v5033_v48 = vpop.eup %5032 }
 0x8c7   : > { %v3980_v29 = vmul.f32 %v5033_v48, %v3966_v30 }
 0x8c9   : > { %v3988_v44 = vmul.f32 %v4484_v7, %v3980_v29 }
 0x8ca   : > { %v5035_v8 = vpop.eup %5034 }
 0x8cb   : > { %v3996_v9 = vadd.f32 %v4485_v45, %v3988_v44  ;;  %v3981_v21 = vmul.f32 %v5035_v8, %v3967_v1 }
 0x8cd   : > { %3998 = vst [vmem:[%s6089_s30] sm:$0xff] %v3996_v9  ;;  %v3989_v22 = vmul.f32 %v4484_v7, %v3981_v21 }
 0x8cf   : > { %v3997_v11 = vadd.f32 %v4485_v45, %v3989_v22 }
 0x8d1   : > { %3999 = vst [vmem:[%s6089_s30 + $0x8] sm:$0xff] %v3997_v11 }
 0x8d2 PF: > { %s6090_s24 = sld [smem:[#allocation11_spill]]  ;;  %s6093_s21 = smov %s5150_s22 }
 0x8d3   : > { %s6091_s28 = sld [smem:[#allocation10_spill]] }
 0x8d4   : > { %s6092_s23 = sld [smem:[#allocation12_spill]] }
 0x8d8   : > { %p29_p6 = scmp.ge.s32.totalorder %s6090_s24, 4  }
 0x8d9   : > { %s6094_s22 = smov %s6091_s28 }
 0x8da   :  { %31 = sbr.rel (!%p29_p6) target bundleno = 18 (0x12), region = 179 }
 0x8df   :  { %4011 = vsyncpa [#allocation4], 1 }
 0x8e0   :  { %4013 = vsyncpa [#allocation4 + $0x1], 1 }
 0x8e1   :  { %4014 = vsyncpa [#allocation6], 1 }
 0x8e2   :  { %4016 = vsyncpa [#allocation6 + $0x1], 1 }

</bundles_post_ra>
